<compile_context>
chip_gen: v6e
topology: v6e:2x2x1
jax: 0.10.0
libtpu: 0.0.40
codegen_flags: <defaults>
</compile_context>

<pallas_src>
import jax
import jax.numpy as jnp
from jax.experimental import pallas as pl
from jax.experimental.pallas import tpu as pltpu

EPS = 1e-5  # nn.BatchNorm2d default eps


# ----------------------------------------------------------------------------
# In-kernel helpers
# ----------------------------------------------------------------------------
def _x_taps(x_ref, G, Wrow, Pe):
    """Concatenate the 9 shifted views of the guarded, flattened, padded image.

    x_ref: (Cin, PPp) bf16, pixels on lanes.  Returns (9*Cin, Pe) bf16 where row
    t*Cin + ci is input channel ci sampled at tap t = ky*3 + kx.
    """
    pieces = []
    for ky in range(3):
        for kx in range(3):
            off = G + (ky - 1) * Wrow + (kx - 1)
            pieces.append(x_ref[:, pl.ds(off, Pe)])
    return jnp.concatenate(pieces, axis=0)


def _make_stats_kernel(Wrow, G, Pe):
    """conv1 (one wide-K matmul) + per-(image, chunk) BN partial sums."""

    def kernel(x_ref, w1_ref, m_ref, s1_ref, s2_ref):
        # x_ref : (Cin, PPp)      bf16
        # w1_ref: (TC1, 9*Cin)    bf16
        # m_ref : (1, Pe)         f32   1.0 on real output pixels, 0.0 elsewhere
        # s1/s2 : (TC1, 1)        f32   sum / sum of squares over real pixels
        x9 = _x_taps(x_ref, G, Wrow, Pe)                            # (9*Cin, Pe)
        y = jnp.dot(w1_ref[...], x9,
                    preferred_element_type=jnp.float32)             # (TC1, Pe) f32
        ym = y * m_ref[...]
        s1_ref[...] = jnp.sum(ym, axis=1, keepdims=True)
        s2_ref[...] = jnp.sum(ym * y, axis=1, keepdims=True)

    return kernel


def _make_fused_kernel(Wrow, G, Pe, M, n_chunks):
    """Recompute conv1 -> BN(batch stats) -> ReLU -> conv2 chunk -> (+bias, sigmoid)."""

    def kernel(x_ref, w1_ref, m_ref, sc_ref, sh_ref, w2_ref, b_ref,
               o_ref, acc_ref, x9_ref):
        # x_ref : (Cin, PPp) bf16 ; w1_ref: (TC1, 9*Cin) bf16 ; m_ref: (1, Pe) f32
        # sc/sh : (TC1, 1) f32 BN scale/shift ; w2_ref: (Cout, 9*TC1) bf16
        # b_ref : (Cout, 1) f32 ; o_ref/acc_ref: (Cout, M) f32 ; x9_ref: (9*Cin, Pe) bf16
        c = pl.program_id(1)

        @pl.when(c == 0)
        def _init():
            acc_ref[...] = jnp.zeros_like(acc_ref)
            # x im2col built once per image and reused by every mid-channel chunk.
            x9_ref[...] = _x_taps(x_ref, G, Wrow, Pe)

        # conv1 for this chunk of mid channels (f32 MXU accumulation)
        y = jnp.dot(w1_ref[...], x9_ref[...],
                    preferred_element_type=jnp.float32)             # (TC1, Pe)
        # BN + ReLU; masking to the interior realizes conv2's zero padding.
        h = (jnp.maximum(y * sc_ref[...] + sh_ref[...], 0.0)
             * m_ref[...]).astype(jnp.bfloat16)                     # (TC1, Pe)

        # conv2 partial contribution: single wide-K matmul (K = 9*TC1)
        pieces = []
        for ky in range(3):
            for kx in range(3):
                off = ky * Wrow + kx
                pieces.append(h[:, off:off + M])
        h9 = jnp.concatenate(pieces, axis=0)                        # (9*TC1, M)
        acc_ref[...] += jnp.dot(w2_ref[...], h9,
                                preferred_element_type=jnp.float32)  # (Cout, M)

        @pl.when(c == n_chunks - 1)
        def _finalize():
            o_ref[...] = jax.nn.sigmoid(acc_ref[...] + b_ref[...])

    return kernel


def _vmem_limit_bytes(block_bytes, temp_bytes):
    # double-buffered pipeline blocks + in-kernel temporaries + headroom,
    # clamped to the v7x-safe 64 MiB.  (Larger H*W needs a row-tiled path.)
    need = 2 * block_bytes + temp_bytes
    return int(max(16 << 20, min(2 * need + (8 << 20), 64 << 20)))


# ----------------------------------------------------------------------------
# Forward pass
# ----------------------------------------------------------------------------
def fuser_layer_forward(x_nchw, params):
    w1, b1, gamma, beta, w2, b2 = params
    del b1  # conv1 bias is cancelled exactly by BatchNorm's batch-mean subtraction

    N, Cin, H, W = x_nchw.shape
    C1 = w1.shape[2]
    Cout = w2.shape[2]

    # mid-channel chunking (reduction grid axis of kernel 2)
    if C1 % 32 == 0:
        TC1 = 32
    elif C1 % 16 == 0:
        TC1 = 16
    else:
        TC1 = C1
    NC = C1 // TC1

    # geometry: padded image flattened row-major, pixels on the lane axis
    Hp = H + 2
    Wrow = ((W + 2 + 7) // 8) * 8       # row stride, multiple of 8
    P = Hp * Wrow                        # padded pixels per image
    Pe = P + Wrow                        # conv1 evaluated on one extra masked row so
                                         # conv2's tap reads stay in-bounds
    M = H * Wrow                         # conv2 output rows (garbage cols sliced later)
    G = 2 * Wrow                         # front guard (>= Wrow + 1)
    E = 3 * Wrow                         # back guard
    PPp = G + P + E

    # ---- input: NCHW (channels already leading) -> cast, zero-pad, flatten, guard ----
    xb = x_nchw.astype(jnp.bfloat16)
    xb = jnp.pad(xb, ((0, 0), (0, 0), (1, 1), (1, Wrow - W - 1)))    # (N, Cin, Hp, Wrow)
    xb = xb.reshape(N, Cin, P)
    xb = jnp.pad(xb, ((0, 0), (0, 0), (G, E)))                        # (N, Cin, PPp)

    # interior mask (real output pixels), one lane-dense row shared by every grid step
    ids = jnp.arange(Pe, dtype=jnp.int32)
    r, c = ids // Wrow, ids % Wrow
    interior = ((r >= 1) & (r <= H) & (c >= 1) & (c <= W))
    mask = interior.astype(jnp.float32).reshape(1, Pe)

    # weights / BN params in per-chunk, transposed layout
    w1c = (w1.reshape(9, Cin, NC, TC1).transpose(2, 3, 0, 1)
             .reshape(NC, TC1, 9 * Cin).astype(jnp.bfloat16))
    w2c = (w2.reshape(9, NC, TC1, Cout).transpose(1, 3, 0, 2)
             .reshape(NC, Cout, 9 * TC1).astype(jnp.bfloat16))
    b2c = b2.reshape(Cout, 1).astype(jnp.float32)

    # ---- VMEM budgets derived from the actual block / temporary sizes ----
    x_blk = Cin * PPp * 2
    w1_blk = TC1 * 9 * Cin * 2
    m_blk = Pe * 4
    x9_tmp = 9 * Cin * Pe * 2
    y_tmp = 3 * TC1 * Pe * 4
    vmem1 = _vmem_limit_bytes(x_blk + w1_blk + m_blk + 2 * TC1 * 4, x9_tmp + y_tmp)
    w2_blk = Cout * 9 * TC1 * 2
    out_blk = Cout * M * 4
    h9_tmp = 2 * 9 * TC1 * M * 2
    h_tmp = TC1 * Pe * 6
    vmem2 = _vmem_limit_bytes(
        x_blk + w1_blk + m_blk + 2 * TC1 * 4 + w2_blk + Cout * 4 + out_blk,
        out_blk + x9_tmp + y_tmp + h_tmp + h9_tmp)

    # ---- kernel 1: conv1 + BN partial statistics, grid over (image, C1 chunk) ----
    s1, s2 = pl.pallas_call(
        _make_stats_kernel(Wrow, G, Pe),
        grid=(N, NC),
        in_specs=[
            pl.BlockSpec((None, Cin, PPp), lambda n, cc: (n, 0, 0)),
            pl.BlockSpec((None, TC1, 9 * Cin), lambda n, cc: (cc, 0, 0)),
            pl.BlockSpec((1, Pe), lambda n, cc: (0, 0)),
        ],
        out_specs=[
            pl.BlockSpec((None, None, TC1, 1), lambda n, cc: (n, cc, 0, 0)),
            pl.BlockSpec((None, None, TC1, 1), lambda n, cc: (n, cc, 0, 0)),
        ],
        out_shape=(
            jax.ShapeDtypeStruct((N, NC, TC1, 1), jnp.float32),
            jax.ShapeDtypeStruct((N, NC, TC1, 1), jnp.float32),
        ),
        compiler_params=pltpu.CompilerParams(
            dimension_semantics=("parallel", "parallel"),
            vmem_limit_bytes=vmem1),
    )(xb, w1c, mask)

    # ---- tiny BN finalize in XLA: batch mean / biased variance -> scale, shift ----
    cnt = float(N * H * W)
    mean = jnp.sum(s1, axis=0) / cnt                                  # (NC, TC1, 1)
    var = jnp.maximum(jnp.sum(s2, axis=0) / cnt - mean * mean, 0.0)
    inv = jax.lax.rsqrt(var + EPS)
    gamma_c = gamma.reshape(NC, TC1, 1).astype(jnp.float32)
    beta_c = beta.reshape(NC, TC1, 1).astype(jnp.float32)
    scale = gamma_c * inv
    shift = beta_c - mean * scale

    # ---- kernel 2: conv1 (recomputed) + BN + ReLU + conv2 + bias + sigmoid, fused ----
    out = pl.pallas_call(
        _make_fused_kernel(Wrow, G, Pe, M, NC),
        grid=(N, NC),
        in_specs=[
            pl.BlockSpec((None, Cin, PPp), lambda n, cc: (n, 0, 0)),
            pl.BlockSpec((None, TC1, 9 * Cin), lambda n, cc: (cc, 0, 0)),
            pl.BlockSpec((1, Pe), lambda n, cc: (0, 0)),
            pl.BlockSpec((None, TC1, 1), lambda n, cc: (cc, 0, 0)),
            pl.BlockSpec((None, TC1, 1), lambda n, cc: (cc, 0, 0)),
            pl.BlockSpec((None, Cout, 9 * TC1), lambda n, cc: (cc, 0, 0)),
            pl.BlockSpec((Cout, 1), lambda n, cc: (0, 0)),
        ],
        out_specs=pl.BlockSpec((None, Cout, M), lambda n, cc: (n, 0, 0)),
        out_shape=jax.ShapeDtypeStruct((N, Cout, M), jnp.float32),
        scratch_shapes=[
            pltpu.VMEM((Cout, M), jnp.float32),        # conv2 accumulator
            pltpu.VMEM((9 * Cin, Pe), jnp.bfloat16),   # x im2col, built once per image
        ],
        compiler_params=pltpu.CompilerParams(
            dimension_semantics=("parallel", "arbitrary"),
            vmem_limit_bytes=vmem2),
    )(xb, w1c, mask, scale, shift, w2c, b2c)

    # (N, Cout, M) -> (N, Cout, H, Wrow) -> drop alignment columns: already NCHW.
    return out.reshape(N, Cout, H, Wrow)[:, :, :, :W]


# ----------------------------------------------------------------------------
# Parameters and pure-JAX reference (for the correctness check)
# ----------------------------------------------------------------------------
def init_params(key, in_ch, out_ch):
    mid = out_ch * 16
    k1, k2, k3, k4, k5, k6 = jax.random.split(key, 6)

    def q(a):  # round to bf16 so Pallas (bf16) and reference (f32) share exact weights
        return a.astype(jnp.bfloat16).astype(jnp.float32)

    # conv weights stored per-tap: (9, cin, cout), tap index t = ky*3 + kx
    w1 = q(jax.random.normal(k1, (9, in_ch, mid), jnp.float32) / (9.0 * in_ch) ** 0.5)
    b1 = q(jax.random.normal(k2, (mid,), jnp.float32) * 0.01)
    gamma = q(1.0 + 0.1 * jax.random.normal(k5, (mid,), jnp.float32))
    beta = q(0.05 * jax.random.normal(k6, (mid,), jnp.float32))
    w2 = q(jax.random.normal(k3, (9, mid, out_ch), jnp.float32) / (9.0 * mid) ** 0.5)
    b2 = q(jax.random.normal(k4, (out_ch,), jnp.float32) * 0.01)
    return (w1, b1, gamma, beta, w2, b2)


def _im2col_3x3(x):
    N, H, W, C = x.shape
    xp = jnp.pad(x, ((0, 0), (1, 1), (1, 1), (0, 0)))
    cols = [xp[:, ky:ky + H, kx:kx + W, :] for ky in range(3) for kx in range(3)]
    return jnp.stack(cols, axis=3).reshape(N * H * W, 9 * C)


def fuser_layer_reference(x_nchw, params):
    """Pure-JAX f32 reference of the PyTorch forward (conv1 bias included)."""
    w1, b1, gamma, beta, w2, b2 = params
    x = jnp.transpose(x_nchw, (0, 2, 3, 1)).astype(jnp.float32)
    N, H, W, Cin = x.shape
    C1, Cout = w1.shape[2], w2.shape[2]
    y = _im2col_3x3(x) @ w1.reshape(9 * Cin, C1) + b1
    mean = jnp.mean(y, axis=0, keepdims=True)
    var = jnp.mean(jnp.square(y - mean), axis=0, keepdims=True)
    h = jnp.maximum((y - mean) * jax.lax.rsqrt(var + EPS) * gamma + beta, 0.0)
    h = h.reshape(N, H, W, C1)
    z = jax.nn.sigmoid(_im2col_3x3(h) @ w2.reshape(9 * C1, Cout) + b2)
    return jnp.transpose(z.reshape(N, H, W, Cout), (0, 3, 1, 2))


if __name__ == "__main__":
    key = jax.random.PRNGKey(0)
    kx_key, kp_key = jax.random.split(key)

    in_ch, out_ch = 4, 4
    N, H, W = 2, 16, 16
    x = jax.random.normal(kx_key, (N, in_ch, H, W), jnp.float32)
    x = x.astype(jnp.bfloat16).astype(jnp.float32)   # shared rounding for the check
    params = init_params(kp_key, in_ch, out_ch)

    fwd = jax.jit(fuser_layer_forward)
    out = jax.block_until_ready(fwd(x, params))
    assert out.shape == (N, out_ch, H, W), out.shape

    ref = jax.block_until_ready(fuser_layer_reference(x, params))
    # Pallas path uses bf16 MXU operands / bf16 intermediate activation with f32
    # accumulation; tolerance sized for that (outputs are post-sigmoid, in [0, 1]).
    err = float(jnp.max(jnp.abs(out - ref)))
    assert jnp.allclose(out, ref, atol=2e-2, rtol=2e-2), err

    print("KERNEL_OK")
</pallas_src>

<mosaic_0001>
module attributes {stable_mosaic.version = 11 : i64} {
  func.func @kernel(%arg0: i32, %arg1: i32, %arg2: memref<1x4x552xbf16, #tpu.memory_space<vmem>>, %arg3: memref<1x32x36xbf16, #tpu.memory_space<vmem>>, %arg4: memref<1x456xf32, #tpu.memory_space<vmem>>, %arg5: memref<1x1x32x1xf32, #tpu.memory_space<vmem>>, %arg6: memref<1x1x32x1xf32, #tpu.memory_space<vmem>>) attributes {dimension_semantics = [#tpu.dimension_semantics<parallel>, #tpu.dimension_semantics<parallel>], iteration_bounds = array<i64: 2, 2>, scalar_prefetch = 0 : i64, scratch_operands = 0 : i64, tpu.core_type = #tpu.core_type<tc>, window_params = [{transform_indices = @transform_0, window_bounds = array<i64: 1, 4, 552>}, {transform_indices = @transform_1, window_bounds = array<i64: 1, 32, 36>}, {pipeline_mode = #tpu.pipeline_mode<synchronous>, transform_indices = @transform_2, window_bounds = array<i64: 1, 456>}, {transform_indices = @transform_3, window_bounds = array<i64: 1, 1, 32, 1>}, {transform_indices = @transform_4, window_bounds = array<i64: 1, 1, 32, 1>}]} {
    %c0 = arith.constant 0 : index
    %c0_0 = arith.constant 0 : index
    %c23 = arith.constant 23 : index
    %0 = vector.load %arg2[%c0, %c0_0, %c23] : memref<1x4x552xbf16, #tpu.memory_space<vmem>>, vector<1x4x456xbf16>
    %1 = vector.shape_cast %0 : vector<1x4x456xbf16> to vector<4x456xbf16>
    %c0_1 = arith.constant 0 : index
    %c0_2 = arith.constant 0 : index
    %c24 = arith.constant 24 : index
    %2 = vector.load %arg2[%c0_1, %c0_2, %c24] : memref<1x4x552xbf16, #tpu.memory_space<vmem>>, vector<1x4x456xbf16>
    %3 = vector.shape_cast %2 : vector<1x4x456xbf16> to vector<4x456xbf16>
    %c0_3 = arith.constant 0 : index
    %c0_4 = arith.constant 0 : index
    %c25 = arith.constant 25 : index
    %4 = vector.load %arg2[%c0_3, %c0_4, %c25] : memref<1x4x552xbf16, #tpu.memory_space<vmem>>, vector<1x4x456xbf16>
    %5 = vector.shape_cast %4 : vector<1x4x456xbf16> to vector<4x456xbf16>
    %c0_5 = arith.constant 0 : index
    %c0_6 = arith.constant 0 : index
    %c47 = arith.constant 47 : index
    %6 = vector.load %arg2[%c0_5, %c0_6, %c47] : memref<1x4x552xbf16, #tpu.memory_space<vmem>>, vector<1x4x456xbf16>
    %7 = vector.shape_cast %6 : vector<1x4x456xbf16> to vector<4x456xbf16>
    %c0_7 = arith.constant 0 : index
    %c0_8 = arith.constant 0 : index
    %c48 = arith.constant 48 : index
    %8 = vector.load %arg2[%c0_7, %c0_8, %c48] : memref<1x4x552xbf16, #tpu.memory_space<vmem>>, vector<1x4x456xbf16>
    %9 = vector.shape_cast %8 : vector<1x4x456xbf16> to vector<4x456xbf16>
    %c0_9 = arith.constant 0 : index
    %c0_10 = arith.constant 0 : index
    %c49 = arith.constant 49 : index
    %10 = vector.load %arg2[%c0_9, %c0_10, %c49] : memref<1x4x552xbf16, #tpu.memory_space<vmem>>, vector<1x4x456xbf16>
    %11 = vector.shape_cast %10 : vector<1x4x456xbf16> to vector<4x456xbf16>
    %c0_11 = arith.constant 0 : index
    %c0_12 = arith.constant 0 : index
    %c71 = arith.constant 71 : index
    %12 = vector.load %arg2[%c0_11, %c0_12, %c71] : memref<1x4x552xbf16, #tpu.memory_space<vmem>>, vector<1x4x456xbf16>
    %13 = vector.shape_cast %12 : vector<1x4x456xbf16> to vector<4x456xbf16>
    %c0_13 = arith.constant 0 : index
    %c0_14 = arith.constant 0 : index
    %c72 = arith.constant 72 : index
    %14 = vector.load %arg2[%c0_13, %c0_14, %c72] : memref<1x4x552xbf16, #tpu.memory_space<vmem>>, vector<1x4x456xbf16>
    %15 = vector.shape_cast %14 : vector<1x4x456xbf16> to vector<4x456xbf16>
    %c0_15 = arith.constant 0 : index
    %c0_16 = arith.constant 0 : index
    %c73 = arith.constant 73 : index
    %16 = vector.load %arg2[%c0_15, %c0_16, %c73] : memref<1x4x552xbf16, #tpu.memory_space<vmem>>, vector<1x4x456xbf16>
    %17 = vector.shape_cast %16 : vector<1x4x456xbf16> to vector<4x456xbf16>
    %18 = tpu.concatenate %1, %3, %5, %7, %9, %11, %13, %15, %17 in 0 : vector<4x456xbf16>, vector<4x456xbf16>, vector<4x456xbf16>, vector<4x456xbf16>, vector<4x456xbf16>, vector<4x456xbf16>, vector<4x456xbf16>, vector<4x456xbf16>, vector<4x456xbf16> -> vector<36x456xbf16>
    %c0_17 = arith.constant 0 : index
    %c0_18 = arith.constant 0 : index
    %c0_19 = arith.constant 0 : index
    %19 = vector.load %arg3[%c0_17, %c0_18, %c0_19] : memref<1x32x36xbf16, #tpu.memory_space<vmem>>, vector<1x32x36xbf16>
    %20 = vector.shape_cast %19 : vector<1x32x36xbf16> to vector<32x36xbf16>
    %cst = arith.constant dense<0.000000e+00> : vector<32x456xf32>
    %21 = tpu.matmul %20, %18, %cst {dimension_numbers = #tpu.dot_dimension_numbers<[1], [0], [0], [1], [0, 0, 1, 1], [], []>} : vector<32x36xbf16>, vector<36x456xbf16>, vector<32x456xf32> -> vector<32x456xf32>
    %c0_20 = arith.constant 0 : index
    %c0_21 = arith.constant 0 : index
    %22 = vector.load %arg4[%c0_20, %c0_21] : memref<1x456xf32, #tpu.memory_space<vmem>>, vector<1x456xf32>
    %23 = vector.broadcast %22 : vector<1x456xf32> to vector<32x456xf32>
    %24 = arith.mulf %21, %23 : vector<32x456xf32>
    %cst_22 = arith.constant dense<0.000000e+00> : vector<32xf32>
    %25 = vector.multi_reduction <add>, %24, %cst_22 [1] : vector<32x456xf32> to vector<32xf32>
    %26 = vector.shape_cast %25 : vector<32xf32> to vector<32x1xf32>
    %c0_23 = arith.constant 0 : index
    %c0_24 = arith.constant 0 : index
    %c0_25 = arith.constant 0 : index
    %c0_26 = arith.constant 0 : index
    %27 = vector.load %arg5[%c0_23, %c0_24, %c0_25, %c0_26] : memref<1x1x32x1xf32, #tpu.memory_space<vmem>>, vector<1x1x32x1xf32>
    %28 = vector.shape_cast %27 : vector<1x1x32x1xf32> to vector<32x1xf32>
    %29 = vector.shape_cast %26 : vector<32x1xf32> to vector<1x1x32x1xf32>
    tpu.vector_store %arg5[%c0_23, %c0_24, %c0_25, %c0_26], %29 {strides = array<i32>} : memref<1x1x32x1xf32, #tpu.memory_space<vmem>>, vector<1x1x32x1xf32>,
    %30 = arith.mulf %24, %21 : vector<32x456xf32>
    %cst_27 = arith.constant dense<0.000000e+00> : vector<32xf32>
    %31 = vector.multi_reduction <add>, %30, %cst_27 [1] : vector<32x456xf32> to vector<32xf32>
    %32 = vector.shape_cast %31 : vector<32xf32> to vector<32x1xf32>
    %c0_28 = arith.constant 0 : index
    %c0_29 = arith.constant 0 : index
    %c0_30 = arith.constant 0 : index
    %c0_31 = arith.constant 0 : index
    %33 = vector.load %arg6[%c0_28, %c0_29, %c0_30, %c0_31] : memref<1x1x32x1xf32, #tpu.memory_space<vmem>>, vector<1x1x32x1xf32>
    %34 = vector.shape_cast %33 : vector<1x1x32x1xf32> to vector<32x1xf32>
    %35 = vector.shape_cast %32 : vector<32x1xf32> to vector<1x1x32x1xf32>
    tpu.vector_store %arg6[%c0_28, %c0_29, %c0_30, %c0_31], %35 {strides = array<i32>} : memref<1x1x32x1xf32, #tpu.memory_space<vmem>>, vector<1x1x32x1xf32>,
    return
  }
  func.func @transform_0(%arg0: i32, %arg1: i32) -> (i32, i32, i32) {
    %c0_i32 = arith.constant 0 : i32
    %c0_i32_0 = arith.constant 0 : i32
    %c0_i32_1 = arith.constant 0 : i32
    return %arg0, %c0_i32, %c0_i32_0 : i32, i32, i32
  }
  func.func @transform_1(%arg0: i32, %arg1: i32) -> (i32, i32, i32) {
    %c0_i32 = arith.constant 0 : i32
    %c0_i32_0 = arith.constant 0 : i32
    %c0_i32_1 = arith.constant 0 : i32
    return %arg1, %c0_i32, %c0_i32_0 : i32, i32, i32
  }
  func.func @transform_2(%arg0: i32, %arg1: i32) -> (i32, i32) {
    %c0_i32 = arith.constant 0 : i32
    %c0_i32_0 = arith.constant 0 : i32
    %c0_i32_1 = arith.constant 0 : i32
    return %c0_i32, %c0_i32_0 : i32, i32
  }
  func.func @transform_3(%arg0: i32, %arg1: i32) -> (i32, i32, i32, i32) {
    %c0_i32 = arith.constant 0 : i32
    %c0_i32_0 = arith.constant 0 : i32
    %c0_i32_1 = arith.constant 0 : i32
    return %arg0, %arg1, %c0_i32, %c0_i32_0 : i32, i32, i32, i32
  }
  func.func @transform_4(%arg0: i32, %arg1: i32) -> (i32, i32, i32, i32) {
    %c0_i32 = arith.constant 0 : i32
    %c0_i32_0 = arith.constant 0 : i32
    %c0_i32_1 = arith.constant 0 : i32
    return %arg0, %arg1, %c0_i32, %c0_i32_0 : i32, i32, i32, i32
  }
}

module attributes {stable_mosaic.version = 11 : i64} {
  func.func @kernel(%arg0: i32, %arg1: i32, %arg2: memref<1x4x552xbf16, #tpu.memory_space<vmem>>, %arg3: memref<1x32x36xbf16, #tpu.memory_space<vmem>>, %arg4: memref<1x456xf32, #tpu.memory_space<vmem>>, %arg5: memref<1x32x1xf32, #tpu.memory_space<vmem>>, %arg6: memref<1x32x1xf32, #tpu.memory_space<vmem>>, %arg7: memref<1x4x288xbf16, #tpu.memory_space<vmem>>, %arg8: memref<4x1xf32, #tpu.memory_space<vmem>>, %arg9: memref<1x4x384xf32, #tpu.memory_space<vmem>>, %arg10: memref<4x384xf32, #tpu.memory_space<vmem>>, %arg11: memref<36x456xbf16, #tpu.memory_space<vmem>>) attributes {dimension_semantics = [#tpu.dimension_semantics<parallel>, #tpu.dimension_semantics<arbitrary>], iteration_bounds = array<i64: 2, 2>, scalar_prefetch = 0 : i64, scratch_operands = 2 : i64, tpu.core_type = #tpu.core_type<tc>, window_params = [{transform_indices = @transform_0, window_bounds = array<i64: 1, 4, 552>}, {transform_indices = @transform_1, window_bounds = array<i64: 1, 32, 36>}, {pipeline_mode = #tpu.pipeline_mode<synchronous>, transform_indices = @transform_2, window_bounds = array<i64: 1, 456>}, {transform_indices = @transform_3, window_bounds = array<i64: 1, 32, 1>}, {transform_indices = @transform_4, window_bounds = array<i64: 1, 32, 1>}, {transform_indices = @transform_5, window_bounds = array<i64: 1, 4, 288>}, {pipeline_mode = #tpu.pipeline_mode<synchronous>, transform_indices = @transform_6, window_bounds = array<i64: 4, 1>}, {transform_indices = @transform_7, window_bounds = array<i64: 1, 4, 384>}]} {
    %c0_i32 = arith.constant 0 : i32
    %0 = arith.cmpi eq, %arg1, %c0_i32 : i32
    %1 = arith.extui %0 : i1 to i32
    %c0_i32_0 = arith.constant 0 : i32
    %2 = arith.cmpi ne, %1, %c0_i32_0 : i32
    scf.if %2 {
      %cst_23 = arith.constant 0.000000e+00 : f32
      %40 = vector.broadcast %cst_23 : f32 to vector<4x384xf32>
      %c0_24 = arith.constant 0 : index
      %c0_25 = arith.constant 0 : index
      %41 = vector.load %arg10[%c0_24, %c0_25] : memref<4x384xf32, #tpu.memory_space<vmem>>, vector<4x384xf32>
      tpu.vector_store %arg10[%c0_24, %c0_25], %40 {strides = array<i32>} : memref<4x384xf32, #tpu.memory_space<vmem>>, vector<4x384xf32>,
      %c0_26 = arith.constant 0 : index
      %c0_27 = arith.constant 0 : index
      %c23 = arith.constant 23 : index
      %42 = vector.load %arg2[%c0_26, %c0_27, %c23] : memref<1x4x552xbf16, #tpu.memory_space<vmem>>, vector<1x4x456xbf16>
      %43 = vector.shape_cast %42 : vector<1x4x456xbf16> to vector<4x456xbf16>
      %c0_28 = arith.constant 0 : index
      %c0_29 = arith.constant 0 : index
      %c24 = arith.constant 24 : index
      %44 = vector.load %arg2[%c0_28, %c0_29, %c24] : memref<1x4x552xbf16, #tpu.memory_space<vmem>>, vector<1x4x456xbf16>
      %45 = vector.shape_cast %44 : vector<1x4x456xbf16> to vector<4x456xbf16>
      %c0_30 = arith.constant 0 : index
      %c0_31 = arith.constant 0 : index
      %c25 = arith.constant 25 : index
      %46 = vector.load %arg2[%c0_30, %c0_31, %c25] : memref<1x4x552xbf16, #tpu.memory_space<vmem>>, vector<1x4x456xbf16>
      %47 = vector.shape_cast %46 : vector<1x4x456xbf16> to vector<4x456xbf16>
      %c0_32 = arith.constant 0 : index
      %c0_33 = arith.constant 0 : index
      %c47 = arith.constant 47 : index
      %48 = vector.load %arg2[%c0_32, %c0_33, %c47] : memref<1x4x552xbf16, #tpu.memory_space<vmem>>, vector<1x4x456xbf16>
      %49 = vector.shape_cast %48 : vector<1x4x456xbf16> to vector<4x456xbf16>
      %c0_34 = arith.constant 0 : index
      %c0_35 = arith.constant 0 : index
      %c48 = arith.constant 48 : index
      %50 = vector.load %arg2[%c0_34, %c0_35, %c48] : memref<1x4x552xbf16, #tpu.memory_space<vmem>>, vector<1x4x456xbf16>
      %51 = vector.shape_cast %50 : vector<1x4x456xbf16> to vector<4x456xbf16>
      %c0_36 = arith.constant 0 : index
      %c0_37 = arith.constant 0 : index
      %c49 = arith.constant 49 : index
      %52 = vector.load %arg2[%c0_36, %c0_37, %c49] : memref<1x4x552xbf16, #tpu.memory_space<vmem>>, vector<1x4x456xbf16>
      %53 = vector.shape_cast %52 : vector<1x4x456xbf16> to vector<4x456xbf16>
      %c0_38 = arith.constant 0 : index
      %c0_39 = arith.constant 0 : index
      %c71 = arith.constant 71 : index
      %54 = vector.load %arg2[%c0_38, %c0_39, %c71] : memref<1x4x552xbf16, #tpu.memory_space<vmem>>, vector<1x4x456xbf16>
      %55 = vector.shape_cast %54 : vector<1x4x456xbf16> to vector<4x456xbf16>
      %c0_40 = arith.constant 0 : index
      %c0_41 = arith.constant 0 : index
      %c72 = arith.constant 72 : index
      %56 = vector.load %arg2[%c0_40, %c0_41, %c72] : memref<1x4x552xbf16, #tpu.memory_space<vmem>>, vector<1x4x456xbf16>
      %57 = vector.shape_cast %56 : vector<1x4x456xbf16> to vector<4x456xbf16>
      %c0_42 = arith.constant 0 : index
      %c0_43 = arith.constant 0 : index
      %c73 = arith.constant 73 : index
      %58 = vector.load %arg2[%c0_42, %c0_43, %c73] : memref<1x4x552xbf16, #tpu.memory_space<vmem>>, vector<1x4x456xbf16>
      %59 = vector.shape_cast %58 : vector<1x4x456xbf16> to vector<4x456xbf16>
      %60 = tpu.concatenate %43, %45, %47, %49, %51, %53, %55, %57, %59 in 0 : vector<4x456xbf16>, vector<4x456xbf16>, vector<4x456xbf16>, vector<4x456xbf16>, vector<4x456xbf16>, vector<4x456xbf16>, vector<4x456xbf16>, vector<4x456xbf16>, vector<4x456xbf16> -> vector<36x456xbf16>
      %c0_44 = arith.constant 0 : index
      %c0_45 = arith.constant 0 : index
      %61 = vector.load %arg11[%c0_44, %c0_45] : memref<36x456xbf16, #tpu.memory_space<vmem>>, vector<36x456xbf16>
      tpu.vector_store %arg11[%c0_44, %c0_45], %60 {strides = array<i32>} : memref<36x456xbf16, #tpu.memory_space<vmem>>, vector<36x456xbf16>,
    } else {
    }
    %c0 = arith.constant 0 : index
    %c0_1 = arith.constant 0 : index
    %c0_2 = arith.constant 0 : index
    %3 = vector.load %arg3[%c0, %c0_1, %c0_2] : memref<1x32x36xbf16, #tpu.memory_space<vmem>>, vector<1x32x36xbf16>
    %4 = vector.shape_cast %3 : vector<1x32x36xbf16> to vector<32x36xbf16>
    %c0_3 = arith.constant 0 : index
    %c0_4 = arith.constant 0 : index
    %5 = vector.load %arg11[%c0_3, %c0_4] : memref<36x456xbf16, #tpu.memory_space<vmem>>, vector<36x456xbf16>
    %cst = arith.constant dense<0.000000e+00> : vector<32x456xf32>
    %6 = tpu.matmul %4, %5, %cst {dimension_numbers = #tpu.dot_dimension_numbers<[1], [0], [0], [1], [0, 0, 1, 1], [], []>} : vector<32x36xbf16>, vector<36x456xbf16>, vector<32x456xf32> -> vector<32x456xf32>
    %c0_5 = arith.constant 0 : index
    %c0_6 = arith.constant 0 : index
    %c0_7 = arith.constant 0 : index
    %7 = vector.load %arg5[%c0_5, %c0_6, %c0_7] : memref<1x32x1xf32, #tpu.memory_space<vmem>>, vector<1x32x1xf32>
    %8 = vector.shape_cast %7 : vector<1x32x1xf32> to vector<32x1xf32>
    %9 = vector.broadcast %8 : vector<32x1xf32> to vector<32x456xf32>
    %10 = arith.mulf %6, %9 : vector<32x456xf32>
    %c0_8 = arith.constant 0 : index
    %c0_9 = arith.constant 0 : index
    %c0_10 = arith.constant 0 : index
    %11 = vector.load %arg6[%c0_8, %c0_9, %c0_10] : memref<1x32x1xf32, #tpu.memory_space<vmem>>, vector<1x32x1xf32>
    %12 = vector.shape_cast %11 : vector<1x32x1xf32> to vector<32x1xf32>
    %13 = vector.broadcast %12 : vector<32x1xf32> to vector<32x456xf32>
    %14 = arith.addf %10, %13 : vector<32x456xf32>
    %cst_11 = arith.constant 0.000000e+00 : f32
    %15 = vector.broadcast %cst_11 : f32 to vector<32x456xf32>
    %16 = arith.maximumf %14, %15 : vector<32x456xf32>
    %c0_12 = arith.constant 0 : index
    %c0_13 = arith.constant 0 : index
    %17 = vector.load %arg4[%c0_12, %c0_13] : memref<1x456xf32, #tpu.memory_space<vmem>>, vector<1x456xf32>
    %18 = vector.broadcast %17 : vector<1x456xf32> to vector<32x456xf32>
    %19 = arith.mulf %16, %18 : vector<32x456xf32>
    %20 = arith.truncf %19 : vector<32x456xf32> to vector<32x456xbf16>
    %21 = vector.extract_strided_slice %20 {offsets = [0, 0], sizes = [32, 384], strides = [1, 1]} : vector<32x456xbf16> to vector<32x384xbf16>
    %22 = vector.extract_strided_slice %20 {offsets = [0, 1], sizes = [32, 384], strides = [1, 1]} : vector<32x456xbf16> to vector<32x384xbf16>
    %23 = vector.extract_strided_slice %20 {offsets = [0, 2], sizes = [32, 384], strides = [1, 1]} : vector<32x456xbf16> to vector<32x384xbf16>
    %24 = vector.extract_strided_slice %20 {offsets = [0, 24], sizes = [32, 384], strides = [1, 1]} : vector<32x456xbf16> to vector<32x384xbf16>
    %25 = vector.extract_strided_slice %20 {offsets = [0, 25], sizes = [32, 384], strides = [1, 1]} : vector<32x456xbf16> to vector<32x384xbf16>
    %26 = vector.extract_strided_slice %20 {offsets = [0, 26], sizes = [32, 384], strides = [1, 1]} : vector<32x456xbf16> to vector<32x384xbf16>
    %27 = vector.extract_strided_slice %20 {offsets = [0, 48], sizes = [32, 384], strides = [1, 1]} : vector<32x456xbf16> to vector<32x384xbf16>
    %28 = vector.extract_strided_slice %20 {offsets = [0, 49], sizes = [32, 384], strides = [1, 1]} : vector<32x456xbf16> to vector<32x384xbf16>
    %29 = vector.extract_strided_slice %20 {offsets = [0, 50], sizes = [32, 384], strides = [1, 1]} : vector<32x456xbf16> to vector<32x384xbf16>
    %30 = tpu.concatenate %21, %22, %23, %24, %25, %26, %27, %28, %29 in 0 : vector<32x384xbf16>, vector<32x384xbf16>, vector<32x384xbf16>, vector<32x384xbf16>, vector<32x384xbf16>, vector<32x384xbf16>, vector<32x384xbf16>, vector<32x384xbf16>, vector<32x384xbf16> -> vector<288x384xbf16>
    %c0_14 = arith.constant 0 : index
    %c0_15 = arith.constant 0 : index
    %31 = vector.load %arg10[%c0_14, %c0_15] : memref<4x384xf32, #tpu.memory_space<vmem>>, vector<4x384xf32>
    %c0_16 = arith.constant 0 : index
    %c0_17 = arith.constant 0 : index
    %c0_18 = arith.constant 0 : index
    %32 = vector.load %arg7[%c0_16, %c0_17, %c0_18] : memref<1x4x288xbf16, #tpu.memory_space<vmem>>, vector<1x4x288xbf16>
    %33 = vector.shape_cast %32 : vector<1x4x288xbf16> to vector<4x288xbf16>
    %cst_19 = arith.constant dense<0.000000e+00> : vector<4x384xf32>
    %34 = tpu.matmul %33, %30, %cst_19 {dimension_numbers = #tpu.dot_dimension_numbers<[1], [0], [0], [1], [0, 0, 1, 1], [], []>} : vector<4x288xbf16>, vector<288x384xbf16>, vector<4x384xf32> -> vector<4x384xf32>
    %35 = arith.addf %31, %34 : vector<4x384xf32>
    %c0_20 = arith.constant 0 : index
    %c0_21 = arith.constant 0 : index
    %36 = vector.load %arg10[%c0_20, %c0_21] : memref<4x384xf32, #tpu.memory_space<vmem>>, vector<4x384xf32>
    tpu.vector_store %arg10[%c0_20, %c0_21], %35 {strides = array<i32>} : memref<4x384xf32, #tpu.memory_space<vmem>>, vector<4x384xf32>,
    %c1_i32 = arith.constant 1 : i32
    %37 = arith.cmpi eq, %arg1, %c1_i32 : i32
    %38 = arith.extui %37 : i1 to i32
    %c0_i32_22 = arith.constant 0 : i32
    %39 = arith.cmpi ne, %38, %c0_i32_22 : i32
    scf.if %39 {
      %c0_23 = arith.constant 0 : index
      %c0_24 = arith.constant 0 : index
      %40 = vector.load %arg10[%c0_23, %c0_24] : memref<4x384xf32, #tpu.memory_space<vmem>>, vector<4x384xf32>
      %c0_25 = arith.constant 0 : index
      %c0_26 = arith.constant 0 : index
      %41 = vector.load %arg8[%c0_25, %c0_26] : memref<4x1xf32, #tpu.memory_space<vmem>>, vector<4x1xf32>
      %42 = vector.broadcast %41 : vector<4x1xf32> to vector<4x384xf32>
      %43 = arith.addf %40, %42 : vector<4x384xf32>
      %44 = arith.negf %43 : vector<4x384xf32>
      %45 = math.exp %44 : vector<4x384xf32>
      %cst_27 = arith.constant 1.000000e+00 : f32
      %46 = vector.broadcast %cst_27 : f32 to vector<4x384xf32>
      %47 = arith.addf %46, %45 : vector<4x384xf32>
      %48 = arith.divf %46, %47 : vector<4x384xf32>
      %c0_28 = arith.constant 0 : index
      %c0_29 = arith.constant 0 : index
      %c0_30 = arith.constant 0 : index
      %49 = vector.load %arg9[%c0_28, %c0_29, %c0_30] : memref<1x4x384xf32, #tpu.memory_space<vmem>>, vector<1x4x384xf32>
      %50 = vector.shape_cast %49 : vector<1x4x384xf32> to vector<4x384xf32>
      %51 = vector.shape_cast %48 : vector<4x384xf32> to vector<1x4x384xf32>
      tpu.vector_store %arg9[%c0_28, %c0_29, %c0_30], %51 {strides = array<i32>} : memref<1x4x384xf32, #tpu.memory_space<vmem>>, vector<1x4x384xf32>,
    } else {
    }
    return
  }
  func.func @transform_0(%arg0: i32, %arg1: i32) -> (i32, i32, i32) {
    %c0_i32 = arith.constant 0 : i32
    %c0_i32_0 = arith.constant 0 : i32
    %c0_i32_1 = arith.constant 0 : i32
    return %arg0, %c0_i32, %c0_i32_0 : i32, i32, i32
  }
  func.func @transform_1(%arg0: i32, %arg1: i32) -> (i32, i32, i32) {
    %c0_i32 = arith.constant 0 : i32
    %c0_i32_0 = arith.constant 0 : i32
    %c0_i32_1 = arith.constant 0 : i32
    return %arg1, %c0_i32, %c0_i32_0 : i32, i32, i32
  }
  func.func @transform_2(%arg0: i32, %arg1: i32) -> (i32, i32) {
    %c0_i32 = arith.constant 0 : i32
    %c0_i32_0 = arith.constant 0 : i32
    %c0_i32_1 = arith.constant 0 : i32
    return %c0_i32, %c0_i32_0 : i32, i32
  }
  func.func @transform_3(%arg0: i32, %arg1: i32) -> (i32, i32, i32) {
    %c0_i32 = arith.constant 0 : i32
    %c0_i32_0 = arith.constant 0 : i32
    %c0_i32_1 = arith.constant 0 : i32
    return %arg1, %c0_i32, %c0_i32_0 : i32, i32, i32
  }
  func.func @transform_4(%arg0: i32, %arg1: i32) -> (i32, i32, i32) {
    %c0_i32 = arith.constant 0 : i32
    %c0_i32_0 = arith.constant 0 : i32
    %c0_i32_1 = arith.constant 0 : i32
    return %arg1, %c0_i32, %c0_i32_0 : i32, i32, i32
  }
  func.func @transform_5(%arg0: i32, %arg1: i32) -> (i32, i32, i32) {
    %c0_i32 = arith.constant 0 : i32
    %c0_i32_0 = arith.constant 0 : i32
    %c0_i32_1 = arith.constant 0 : i32
    return %arg1, %c0_i32, %c0_i32_0 : i32, i32, i32
  }
  func.func @transform_6(%arg0: i32, %arg1: i32) -> (i32, i32) {
    %c0_i32 = arith.constant 0 : i32
    %c0_i32_0 = arith.constant 0 : i32
    %c0_i32_1 = arith.constant 0 : i32
    return %c0_i32, %c0_i32_0 : i32, i32
  }
  func.func @transform_7(%arg0: i32, %arg1: i32) -> (i32, i32, i32) {
    %c0_i32 = arith.constant 0 : i32
    %c0_i32_0 = arith.constant 0 : i32
    %c0_i32_1 = arith.constant 0 : i32
    return %arg0, %c0_i32, %c0_i32_0 : i32, i32, i32
  }
}

</mosaic_0001>

<bundles_post_ra>
// kernel: fuser_layer_forward.2
= control target key start
LH: loop header
LB: loop body
LE: loop exit
PB: predicated region body
PF: predicated region fallthrough
CT: control target
= control target key end

     0   :  { %s1088_s15 = smov 0   ;;  %s1090_s16 = smov 0   ;;  %s1368_s0 = inlined_call_operand.vmem [shape: bf16[2,4,552], index: 0, kind: input, shape index: {}]   ;;  %s1369_s1 = inlined_call_operand.vmem [shape: bf16[2,32,36], index: 1, kind: input, shape index: {}]   ;;  %s1370_s2 = inlined_call_operand.vmem [shape: f32[1,456], index: 2, kind: input, shape index: {}]   ;;  %s1371_s3 = inlined_call_operand.vmem [shape: f32[2,2,32,1], index: 3, kind: output, shape index: {0}]   ;;  %s1372_s4 = inlined_call_operand.vmem [shape: f32[2,2,32,1], index: 4, kind: output, shape index: {1}]  }
   0x1   :  { %s1092_s17 = smov 0   ;;  %s1094_s18 = smov 0  }
   0x2   :  { %s1096_s19 = smov 0  }
   0x3 LB: > { %s24_s20 = sadd.s32 1, %s1042_s17  ;;  %s27_s21 = sadd.s32 1, %s1046_s18  ;;  %s1050_s19 = sphi %s1096_s19, %s15_s19   ;;  %s1046_s18 = sphi %s1094_s18, %s1376_s18   ;;  %s1042_s17 = sphi %s1092_s17, %s1375_s17   ;;  %s1038_s16 = sphi %s1090_s16, %s1374_s16   ;;  %s1034_s15 = sphi %s1088_s15, %s1373_s15  }
   0x4   : > { %p25_p0 = scmp.ge.s32.totalorder %s24_s20, 2  ;;  %p934_p1 = scmp.ge.s32.totalorder %s1050_s19, 1 }
   0x5   : > { %p191_p2 = scmp.lt.s32.totalorder %s1050_s19, 5 }
   0x6   : > { %s1378_s20 = smov (%p25_p0, %s24_s20), 0  ;;  %s1380_s21 = smov (!%p25_p0, %s27_s21), %s1046_s18 }
   0x7   : > { %p192_p3 = pnand %p934_p1, %p191_p2  ;;  %p29_p4 = scmp.ge.s32.totalorder %s1380_s21, 2 }
   0x8   : > { %p235_p5 = scmp.lt.s32.totalorder (!%p192_p3), %s1038_s16, 1  ;;  %s1053_s26 = smov (!%p192_p3), 78  }
   0x9   : > { %s1382_s21 = smov (%p29_p4, %s1380_s21), 0  ;;  %195 = sbr.rel (%p192_p3) target bundleno = 693 (0x2b5), region = 32 }
   0xa   : > { %s1054_s27 = smov (!%p192_p3), 103   ;;  %s1055_s28 = smov (!%p192_p3), 102  }
   0xb   : > { %s1056_s29 = smov (!%p192_p3), 80   ;;  %s1057_s30 = smov (!%p192_p3), 79  }
   0xc   : > { %s1058_s5 = smov (!%p192_p3), 127   ;;  %s1059_s6 = smov (!%p192_p3), 126  }
   0xd   : > { %s1060_s7 = smov (!%p192_p3), 104   ;;  %s1061_s8 = smov (!%p192_p3), 105  }
   0xe   : > { %v271_v0 = vlaneseq  ;;  %v1052_v1 = vmov 1983009808   ;;  %s1384_s16 = smov (!%p235_p5, %s1038_s16), 1  ;;  %vm414_vm0 = vcmask 637952   ;;  %vm301_vm1 = vcmask 1039360   ;;  %p240_p6 = scmp.lt.s32.totalorder %s1034_s15, 1 }
   0xf   : > { %v269_v2 = vunpack.c.l.s4 %v1052_v1  ;;  %s955_s22 = smul.u32 10, %s1384_s16  ;;  %vm315_vm2 = vcmask 1031168   ;;  %vm340_vm3 = vcmask 842752   ;;  %vm352_vm4 = vcmask 834560   ;;  %s939_s23 = sshll.u32 %s1384_s16, 3 }
  0x10   : > { %v1122_v3 = vshrl.u32 %v271_v0, 7  ;;  %vm419_vm5 = vcmask 1041408   ;;  %vm375_vm6 = vcmask 654336   ;;  %vm399_vm7 = vcmask 646144   ;;  %s1386_s15 = smov (!%p240_p6, %s1034_s15), 1 }
  0x11   : > { %v270_v4 = vunpack.c.0.s8 %v269_v2  ;;  %s1129_s25 = scalar_lea.vmem %s1368_s0, %s955_s22  ;;  %vm432_vm8 = vcmask 1043456   ;;  %vm328_vm9 = vcmask 850944   ;;  %vm441_vm10 = vcmask 1045504   ;;  %s954_s9 = sshll.u32 %s1386_s15, 4 }
  0x12   : > { %v264_v6 = vld [vmem:[%s1129_s25] sm:$0xff]  ;;  %v265_v17 = vld [vmem:[%s1129_s25 + $0x8] sm:$0x3]  ;;  %s1238_s12 = scalar_lea.vmem %s1369_s1, %s954_s9  ;;  %vm524_vm11 = vcmask 859136   ;;  %vm542_vm12 = vcmask 293888   ;;  %vm707_vm13 = vcmask 588800  }
  0x13   : > { %v273_v5 = vsub.s32 %v270_v4, %v1122_v3  ;;  %v267_v8 = vcombine.high %v264_v6, %v264_v6  ;;  %v284_v11 = vcombine.low %v264_v6, %v264_v6  ;;  %v380_v21 = vcombine.low %v265_v17, %v265_v17  ;;  %s938_s22 = sshll.u32 %s1386_s15, 2 }
  0x14   : > { %s251_s24 = sadd.s32 %s939_s23, %s938_s22  ;;  %vm730_vm14 = vcmask 7168  }
  0x15   : > { %v1132_v7 = vrot.slane %v264_v6, %v273_v5  ;;  %v1136_v9 = vrot.slane %v267_v8, %v273_v5  ;;  %v291_v13 = vrot.slane %v284_v11, %v273_v5  ;;  %v363_v18 = vrot.slane %v265_v17, %v273_v5  ;;  %s940_s25 = sshll.u32 %s251_s24, 3 }
  0x16   : > { %v387_v22 = vrot.slane %v380_v21, %v273_v5 }
  0x17   : > { %404 = vrot.lane.b32.xlu0 %v1132_v7, %s1053_s26  ;;  %v1140_v10 = vcombine.high %v1132_v7, %v1132_v7  ;;  %408 = vrot.lane.b32.xlu1 %v1136_v9, %s1053_s26  ;;  %v1149_v12 = vcombine.high %v1136_v9, %v1136_v9  ;;  %v292_v14 = vcombine.high %v291_v13, %v291_v13 }
  0x18   : > { %v306_v15 = vcombine.low %v1136_v9, %v1136_v9  ;;  %v305_v16 = vcombine.low %v1132_v7, %v1132_v7  ;;  %v319_v19 = vcombine.low %v291_v13, %v291_v13  ;;  %v364_v20 = vcombine.low %v363_v18, %v363_v18 }
  0x19   : > { %v388_v23 = vcombine.low %v387_v22, %v387_v22 }
  0x1b   : > { %406 = vrot.lane.b32.xlu0 %v1140_v10, %s1053_s26  ;;  %336 = vrot.lane.b32.xlu1 %v1136_v9, %s1054_s27 }
  0x1f   : > { %334 = vrot.lane.b32.xlu0 %v1140_v10, %s1054_s27  ;;  %410 = vrot.lane.b32.xlu1 %v1149_v12, %s1053_s26 }
  0x23   : > { %338 = vrot.lane.b32.xlu0 %v1149_v12, %s1054_s27  ;;  %346 = vrot.lane.b32.xlu1 %v292_v14, %s1055_s28 }
  0x27   : > { %348 = vrot.lane.b32.xlu0 %v1132_v7, %s1055_s28  ;;  %350 = vrot.lane.b32.xlu1 %v1140_v10, %s1055_s28 }
  0x2b   : > { %332 = vrot.lane.b32.xlu0 %v1132_v7, %s1054_s27  ;;  %344 = vrot.lane.b32.xlu1 %v291_v13, %s1055_s28  ;;  %s253_s28 = scalar_lea.vmem %s1371_s3, %s940_s25 }
  0x2f   : > { %367 = vrot.lane.b32.xlu0 %v1132_v7, %s1056_s29  ;;  %369 = vrot.lane.b32.xlu1 %v306_v15, %s1056_s29 }
  0x33   : > { %371 = vrot.lane.b32.xlu0 %v1136_v9, %s1056_s29  ;;  %365 = vrot.lane.b32.xlu1 %v305_v16, %s1056_s29 }
  0x37   : > { %391 = vrot.lane.b32.xlu0 %v291_v13, %s1057_s30  ;;  %393 = vrot.lane.b32.xlu1 %v305_v16, %s1057_s30 }
  0x3b   : > { %395 = vrot.lane.b32.xlu0 %v1132_v7, %s1057_s30  ;;  %412 = vrot.lane.b32.xlu1 %v363_v18, %s1053_s26 }
  0x3f   : > { %389 = vrot.lane.b32.xlu0 %v319_v19, %s1057_s30  ;;  %295 = vrot.lane.b32.xlu1 %v292_v14, %s1058_s5 }
  0x43   : > { %297 = vrot.lane.b32.xlu0 %v1132_v7, %s1058_s5  ;;  %299 = vrot.lane.b32.xlu1 %v1140_v10, %s1058_s5 }
  0x47   : > { %293 = vrot.lane.b32.xlu0 %v291_v13, %s1058_s5  ;;  %309 = vrot.lane.b32.xlu1 %v1132_v7, %s1059_s6  ;;  %s262_s5 = scalar_lea.vmem %s1372_s4, %s940_s25 }
  0x4b   : > { %311 = vrot.lane.b32.xlu0 %v306_v15, %s1059_s6  ;;  %313 = vrot.lane.b32.xlu1 %v1136_v9, %s1059_s6 }
  0x4f   : > { %373 = vrot.lane.b32.xlu0 %v364_v20, %s1056_s29  ;;  %307 = vrot.lane.b32.xlu1 %v305_v16, %s1059_s6 }
  0x53   : > { %322 = vrot.lane.b32.xlu0 %v291_v13, %s1060_s7  ;;  %324 = vrot.lane.b32.xlu1 %v305_v16, %s1060_s7 }
  0x57   : > { %326 = vrot.lane.b32.xlu0 %v1132_v7, %s1060_s7  ;;  %397 = vrot.lane.b32.xlu1 %v388_v23, %s1057_s30 }
  0x5b   : > { %320 = vrot.lane.b32.xlu0 %v319_v19, %s1060_s7 }
  0x89   : > { %v405_v24 = vpop.permute.xlu0 %404  ;;  %v409_v25 = vpop.permute.xlu1 %408 }
  0x8d   : > { %v407_v26 = vpop.permute.xlu0 %406  ;;  %v337_v29 = vpop.permute.xlu1 %336 }
  0x8e   : > { %v416_v27 = vsel %vm414_vm0, %v407_v26, %v409_v25  ;;  %v415_v28 = vsel %vm414_vm0, %v405_v24, %v407_v26  ;;  %v1062_v24 = vmov 0  }
  0x8f   : > { %518 = vrot.lane.b32.xlu0 %v416_v27, %s1061_s8  ;;  %516 = vrot.lane.b32.xlu1 %v415_v28, %s1061_s8 }
  0x90   : > { %593 = vmatprep.mubr.bf16.mxu0 %v1062_v24  ;;  %646 = vmatprep.mubr.bf16.mxu1 %v1062_v24 }
  0x91   : > { %v1176_v30 = vpop.permute.xlu0 %334  ;;  %v411_v31 = vpop.permute.xlu1 %410 }
  0x92   : > { %v417_v32 = vsel %vm414_vm0, %v409_v25, %v411_v31  ;;  %v342_v1 = vsel %vm340_vm3, %v1176_v30, %v337_v29 }
  0x93   : > { %520 = vrot.lane.b32.xlu1 %v417_v32, %s1061_s8 }
  0x95   : > { %v339_v33 = vpop.permute.xlu0 %338  ;;  %v1180_v34 = vpop.permute.xlu1 %346 }
  0x96   : > { %v343_v6 = vsel %vm340_vm3, %v337_v29, %v339_v33 }
  0x99   : > { %v349_v35 = vpop.permute.xlu0 %348  ;;  %v351_v36 = vpop.permute.xlu1 %350 }
  0x9a   : > { %v354_v2 = vsel %vm352_vm4, %v1180_v34, %v349_v35  ;;  %v461_v8 = vsel %vm419_vm5, %v339_v33, %v351_v36  ;;  %v355_v14 = vsel %vm352_vm4, %v349_v35, %v351_v36 }
  0x9b   : > { %v455_v18 = vsel %vm419_vm5, %v342_v1, %v354_v2  ;;  %v458_v25 = vsel %vm419_vm5, %v343_v6, %v355_v14  ;;  %v1010_v6 = vld [vmem:[%s1238_s12] sm:$0xff]  }
  0x9c   : > { %v667_v14 = vld [vmem:[%s1370_s2] sm:$0xf] }
  0x9d   : > { %v1182_v37 = vpop.permute.xlu0 %332  ;;  %v345_v38 = vpop.permute.xlu1 %344 }
  0x9e   : > { %v353_v21 = vsel %vm352_vm4, %v345_v38, %v1180_v34  ;;  %v341_v28 = vsel %vm340_vm3, %v1182_v37, %v1176_v30 }
  0x9f   : > { %v452_v33 = vsel %vm419_vm5, %v341_v28, %v353_v21 }
  0xa1   : > { %v1184_v39 = vpop.permute.xlu0 %367  ;;  %v370_v40 = vpop.permute.xlu1 %369 }
  0xa5   : > { %v372_v41 = vpop.permute.xlu0 %371  ;;  %v1186_v42 = vpop.permute.xlu1 %365 }
  0xa6   : > { %v378_v19 = vsel %vm375_vm6, %v370_v40, %v372_v41  ;;  %v376_v26 = vsel %vm375_vm6, %v1186_v42, %v1184_v39 }
  0xa7   : > { %v467_v32 = vsel %vm432_vm8, %v458_v25, %v378_v19  ;;  %v463_v38 = vsel %vm432_vm8, %v452_v33, %v376_v26 }
  0xa9   : > { %v1188_v43 = vpop.permute.xlu0 %391  ;;  %v394_v44 = vpop.permute.xlu1 %393 }
  0xaa   : > { %v401_v15 = vsel %vm399_vm7, %v1188_v43, %v394_v44 }
  0xad   : > { %v396_v45 = vpop.permute.xlu0 %395  ;;  %v413_v46 = vpop.permute.xlu1 %412 }
  0xae   : > { %v418_v47 = vsel %vm414_vm0, %v411_v31, %v413_v46  ;;  %v402_v22 = vsel %vm399_vm7, %v394_v44, %v396_v45 }
  0xaf   : > { %522 = vrot.lane.b32.xlu0 %v418_v47, %s1061_s8  ;;  %v475_v36 = vsel %vm441_vm10, %v467_v32, %v402_v22 }
  0xb1   : > { %v390_v48 = vpop.permute.xlu0 %389  ;;  %v1192_v49 = vpop.permute.xlu1 %295 }
  0xb2   : > { %v400_v29 = vsel %vm399_vm7, %v390_v48, %v1188_v43 }
  0xb5   : > { %v298_v50 = vpop.permute.xlu0 %297  ;;  %v1194_v51 = vpop.permute.xlu1 %299 }
  0xb6   : > { %v304_v59 = vsel %vm301_vm1, %v298_v50, %v1194_v51  ;;  %v303_v31 = vsel %vm301_vm1, %v1192_v49, %v298_v50  ;;  %v431_v46 = vsel %vm419_vm5, %v1149_v12, %v1194_v51 }
  0xb7   : > { %v428_v62 = vsel %vm419_vm5, %v1136_v9, %v304_v59  ;;  %v377_v9 = vsel %vm375_vm6, %v1184_v39, %v370_v40  ;;  %v425_v39 = vsel %vm419_vm5, %v1140_v10, %v303_v31 }
  0xb8   : > { %v465_v23 = vsel %vm432_vm8, %v455_v18, %v377_v9  ;;  %v683_v18 = vsub.s32 3, %v1122_v3 }
  0xb9   : > { %v1196_v52 = vpop.permute.xlu0 %293  ;;  %v1198_v53 = vpop.permute.xlu1 %309  ;;  %v473_v27 = vsel %vm441_vm10, %v465_v23, %v401_v15  ;;  %v675_v15 = vsub.s32 1, %v1122_v3 }
  0xba   : > { %v302_v30 = vsel %vm301_vm1, %v1196_v52, %v1192_v49  ;;  %v1323_v25 = vrot.slane %v667_v14, %v683_v18 }
  0xbb   : > { %v422_v44 = vsel %vm419_vm5, %v1132_v7, %v302_v30  ;;  %v676_v19 = vrot.slane %v667_v14, %v675_v15 }
  0xbd   : > { %v312_v54 = vpop.permute.xlu0 %311  ;;  %v1200_v55 = vpop.permute.xlu1 %313 }
  0xbe   : > { %v318_v60 = vsel %vm315_vm2, %v312_v54, %v1200_v55  ;;  %v317_v34 = vsel %vm315_vm2, %v1198_v53, %v312_v54  ;;  %v440_v48 = vsel %vm432_vm8, %v431_v46, %v1200_v55 }
  0xbf   : > { %v438_v5 = vsel %vm432_vm8, %v428_v62, %v318_v60  ;;  %v436_v43 = vsel %vm432_vm8, %v425_v39, %v317_v34 }
  0xc1   : > { %v374_v56 = vpop.permute.xlu0 %373  ;;  %v1202_v57 = vpop.permute.xlu1 %307 }
  0xc2   : > { %v379_v63 = vsel %vm375_vm6, %v372_v41, %v374_v56  ;;  %v316_v40 = vsel %vm315_vm2, %v1202_v57, %v1198_v53  ;;  %v471_v41 = vsel %vm441_vm10, %v463_v38, %v400_v29 }
  0xc3   : > { %v469_v17 = vsel %vm432_vm8, %v461_v8, %v379_v63  ;;  %v434_v10 = vsel %vm432_vm8, %v422_v44, %v316_v40 }
  0xc5   : > { %v1204_v58 = vpop.permute.xlu0 %322  ;;  %v325_v61 = vpop.permute.xlu1 %324 }
  0xc6   : > { %v330_v37 = vsel %vm328_vm9, %v1204_v58, %v325_v61 }
  0xc9   : > { %v327_v0 = vpop.permute.xlu0 %326  ;;  %v398_v11 = vpop.permute.xlu1 %397 }
  0xca   : > { %v331_v4 = vsel %vm328_vm9, %v325_v61, %v327_v0  ;;  %v403_v16 = vsel %vm399_vm7, %v396_v45, %v398_v11  ;;  %v445_v45 = vsel %vm441_vm10, %v436_v43, %v330_v37  ;;  %v449_v49 = vsel %vm441_vm10, %v440_v48, %v327_v0  ;;  %v1011_v11 = vld [vmem:[%s1238_s12 + $0x8] sm:$0xff]  }
  0xcb   : > { %v447_v13 = vsel %vm441_vm10, %v438_v5, %v331_v4  ;;  %v477_v20 = vsel %vm441_vm10, %v469_v17, %v403_v16  ;;  %v679_v16 = vsub.s32 2, %v1122_v3 }
  0xcc   : > { %504 = vrot.lane.b32.xlu1 %v447_v13, %s1061_s8  ;;  %514 = vrot.lane.b32.xlu0 %v477_v20, %s1061_s8  ;;  %v671_v13 = vsub.s32 0, %v1122_v3 }
  0xcd   : > { %v321_v35 = vpop.permute.xlu0 %320  ;;  %v680_v21 = vrot.slane %v667_v14, %v679_v16 }
  0xce   : > { %v329_v42 = vsel %vm328_vm9, %v321_v35, %v1204_v58  ;;  %v672_v17 = vrot.slane %v667_v14, %v671_v13 }
  0xcf   : > { %v443_v47 = vsel %vm441_vm10, %v434_v10, %v329_v42 }
  0xd0   : > { %510 = vrot.lane.b32.xlu1 %v473_v27, %s1061_s8  ;;  %512 = vrot.lane.b32.xlu0 %v475_v36, %s1061_s8 }
  0xd4   : > { %508 = vrot.lane.b32.xlu1 %v471_v41, %s1061_s8  ;;  %502 = vrot.lane.b32.xlu0 %v445_v45, %s1061_s8 }
  0xd8   : > { %500 = vrot.lane.b32.xlu1 %v443_v47, %s1061_s8  ;;  %506 = vrot.lane.b32.xlu0 %v449_v49, %s1061_s8 }
 0x101   : > { %v519_v7 = vpop.permute.xlu0 %518  ;;  %v517_v50 = vpop.permute.xlu1 %516 }
 0x102   : > { %v531_v52 = vsel %vm524_vm11, %v517_v50, %v519_v7 }
 0x103   : > { %v550_v12 = vsel %vm419_vm5, %v531_v52, 0 }
 0x105   : > { %v521_v53 = vpop.permute.xlu1 %520 }
 0x106   : > { %v532_v54 = vsel %vm524_vm11, %v519_v7, %v521_v53 }
 0x107   : > { %946 = vmatprep.subr.msk.bf16.mxu0 %vm419_vm5, %v532_v54 }
 0x108   : > { %572 = vmatpush1.bf16.msra.mxu0 %v550_v12 }
 0x121   : > { %v523_v51 = vpop.permute.xlu0 %522 }
 0x122   : > { %949 = vmatprep.subr.msk.bf16.mxu1 %vm419_vm5, %v523_v51  ;;  %v533_v55 = vsel %vm524_vm11, %v521_v53, %v523_v51 }
 0x123   : > { %v556_v56 = vsel %vm419_vm5, %v533_v55, 0 }
 0x124   : > { %625 = vmatpush1.bf16.msra.mxu1 %v556_v56 }
 0x13e   : > { %v505_v57 = vpop.permute.xlu1 %504  ;;  %v515_v58 = vpop.permute.xlu0 %514 }
 0x13f   : > { %626 = vmatprep.subr.bf16.mxu1 %v515_v58 }
 0x142   : > { %v511_v59 = vpop.permute.xlu1 %510  ;;  %v513_v60 = vpop.permute.xlu0 %512 }
 0x143   : > { %v529_v61 = vsel %vm524_vm11, %v511_v59, %v513_v60  ;;  %v530_v62 = vsel %vm524_vm11, %v513_v60, %v515_v58 }
 0x144   : > { %573 = vmatprep.subr.bf16.mxu0 %v529_v61  ;;  %627 = vmatpush1.bf16.msra.mxu1 %v530_v62 }
 0x146   : > { %v509_v63 = vpop.permute.xlu1 %508  ;;  %v503_v1 = vpop.permute.xlu0 %502 }
 0x147   : > { %v528_v0 = vsel %vm524_vm11, %v509_v63, %v511_v59  ;;  %v526_v2 = vsel %vm524_vm11, %v503_v1, %v505_v57 }
 0x148   : > { %574 = vmatpush1.bf16.msra.mxu0 %v528_v0 }
 0x149   : > { %575 = vmatprep.subr.bf16.mxu0 %v526_v2 }
 0x14a   : > { %v501_v4 = vpop.permute.xlu1 %500  ;;  %v507_v8 = vpop.permute.xlu0 %506 }
 0x14b   : > { %v525_v5 = vsel %vm524_vm11, %v501_v4, %v503_v1  ;;  %628 = vmatprep.subr.bf16.mxu1 %v507_v8  ;;  %v527_v9 = vsel %vm524_vm11, %v505_v57, %v507_v8 }
 0x14c   : > { %576 = vmatpush1.bf16.msra.mxu0 %v525_v5  ;;  %629 = vmatpush1.bf16.msra.mxu1 %v527_v9 }
 0x14f   : > { %947 = vmatmul.mubr.msk.bf16.vlgmr.msra.gmra.mxu0 %vm542_vm12, %v1010_v6  ;;  %950 = vmatmul.mubr.msk.bf16.vlgmr.msra.gmra.mxu1 %vm542_vm12, %v1010_v6 }
 0x150   : > { %603 = vmatprep.mubr.bf16.mxu0 %v1062_v24  ;;  %656 = vmatprep.mubr.bf16.mxu1 %v1062_v24 }
 0x157   : > { %948 = vmatmul.mubr.msk.bf16.gmra.mxu0 %vm542_vm12, %v1011_v11  ;;  %951 = vmatmul.mubr.msk.bf16.gmra.mxu1 %vm542_vm12, %v1011_v11 }
 0x20f   : > { %v595_v20 = vpop.f32.mrf.mxu0  ;;  %v648_v24 = vpop.f32.mrf.mxu1 }
 0x210   : > { %v689_v22 = vmul.f32 %v672_v17, %v595_v20  ;;  %v691_v27 = vmul.f32 %v680_v21, %v648_v24 }
 0x211   : > { %v597_v23 = vpop.f32.mrf.mxu0  ;;  %v650_v29 = vpop.f32.mrf.mxu1 }
 0x212   : > { %v690_v26 = vmul.f32 %v676_v19, %v597_v23  ;;  %v735_v31 = vmul.f32 %v689_v22, %v595_v20  ;;  %v692_v35 = vmul.f32 %v1323_v25, %v650_v29  ;;  %v737_v39 = vmul.f32 %v691_v27, %v648_v24 }
 0x213   : > { %v599_v28 = vpop.f32.mrf.mxu0  ;;  %v652_v36 = vpop.f32.mrf.mxu1 }
 0x214   : > { %v705_v32 = vadd.f32 %v690_v26, %v689_v22  ;;  %v736_v33 = vmul.f32 %v690_v26, %v597_v23  ;;  %v693_v34 = vmul.f32 %v672_v17, %v599_v28  ;;  %v695_v38 = vmul.f32 %v680_v21, %v652_v36 }
 0x215   : > { %v601_v3 = vpop.f32.mrf.mxu0  ;;  %v738_v40 = vmul.f32 %v692_v35, %v650_v29  ;;  %v654_v42 = vpop.f32.mrf.mxu1  ;;  %v708_v44 = vsel %vm707_vm13, %v692_v35, 0.0 }
 0x216   : > { %v751_v30 = vadd.f32 %v736_v33, %v735_v31  ;;  %v694_v37 = vmul.f32 %v676_v19, %v601_v3  ;;  %v706_v43 = vadd.f32 %v705_v32, %v691_v27  ;;  %v739_v45 = vmul.f32 %v693_v34, %v599_v28 }
 0x217   : > { %v605_v41 = vpop.f32.mrf.mxu0  ;;  %v696_v48 = vmul.f32 %v1323_v25, %v654_v42  ;;  %v658_v7 = vpop.f32.mrf.mxu1  ;;  %v753_v53 = vsel %vm707_vm13, %v738_v40, 0.0  ;;  %v741_v12 = vmul.f32 %v695_v38, %v652_v36 }
 0x218   : > { %v712_v10 = vadd.f32 %v694_v37, %v693_v34  ;;  %v740_v46 = vmul.f32 %v694_v37, %v601_v3  ;;  %v697_v47 = vmul.f32 %v672_v17, %v605_v41  ;;  %v709_v50 = vadd.f32 %v708_v44, %v706_v43 }
 0x219   : > { %v607_v49 = vpop.f32.mrf.mxu0  ;;  %v752_v52 = vadd.f32 %v751_v30, %v737_v39  ;;  %v742_v55 = vmul.f32 %v696_v48, %v654_v42  ;;  %v660_v57 = vpop.f32.mrf.mxu1  ;;  %v714_v60 = vsel %vm707_vm13, %v696_v48, 0.0  ;;  %v699_v1 = vmul.f32 %v680_v21, %v658_v7 }
 0x21a   : > { %v757_v54 = vadd.f32 %v740_v46, %v739_v45  ;;  %v698_v51 = vmul.f32 %v676_v19, %v607_v49  ;;  %710 = vadd.xlane.f32.xlu1 %v709_v50  ;;  %v713_v59 = vadd.f32 %v712_v10, %v695_v38  ;;  %v743_v61 = vmul.f32 %v697_v47, %v605_v41 }
 0x21b   : > { %v609_v56 = vpop.f32.mrf.mxu0  ;;  %v754_v58 = vadd.f32 %v753_v53, %v752_v52  ;;  %v700_v2 = vmul.f32 %v1323_v25, %v660_v57  ;;  %v662_v5 = vpop.f32.mrf.mxu1  ;;  %v759_v8 = vsel %vm707_vm13, %v742_v55, 0.0  ;;  %v745_v27 = vmul.f32 %v699_v1, %v658_v7 }
 0x21c   : > { %v718_v62 = vadd.f32 %v698_v51, %v697_v47  ;;  %v744_v63 = vmul.f32 %v698_v51, %v607_v49  ;;  %v701_v0 = vmul.f32 %v672_v17, %v609_v56  ;;  %v758_v6 = vadd.f32 %v757_v54, %v741_v12 }
 0x21d   : > { %755 = vadd.xlane.f32.xlu0 %v754_v58  ;;  %v611_v4 = vpop.f32.mrf.mxu0  ;;  %v703_v13 = vmul.f32 %v680_v21, %v662_v5  ;;  %v715_v14 = vadd.f32 %v714_v60, %v713_v59  ;;  %v746_v16 = vmul.f32 %v700_v2, %v660_v57  ;;  %v664_v18 = vpop.f32.mrf.mxu1  ;;  %v720_v26 = vsel %vm707_vm13, %v700_v2, 0.0 }
 0x21e   : > { %v763_v9 = vadd.f32 %v744_v63, %v743_v61  ;;  %v702_v11 = vmul.f32 %v676_v19, %v611_v4  ;;  %v747_v15 = vmul.f32 %v701_v0, %v609_v56  ;;  %v760_v20 = vadd.f32 %v759_v8, %v758_v6 }
 0x21f   : > { %v719_v22 = vadd.f32 %v718_v62, %v699_v1  ;;  %v704_v24 = vmul.f32 %v1323_v25, %v664_v18  ;;  %v749_v28 = vmul.f32 %v703_v13, %v662_v5  ;;  %v765_v35 = vsel %vm707_vm13, %v746_v16, 0.0 }
 0x220   : > { %v724_v23 = vadd.f32 %v702_v11, %v701_v0  ;;  %v748_v17 = vmul.f32 %v702_v11, %v611_v4  ;;  %761 = vadd.xlane.f32.xlu1 %v760_v20  ;;  %v764_v33 = vadd.f32 %v763_v9, %v745_v27 }
 0x221   : > { %716 = vadd.xlane.f32.xlu0 %v715_v14  ;;  %v750_v19 = vmul.f32 %v704_v24, %v664_v18  ;;  %v726_v31 = vsel %vm707_vm13, %v704_v24, 0.0  ;;  %v721_v32 = vadd.f32 %v720_v26, %v719_v22 }
 0x222   : > { %v769_v29 = vadd.f32 %v748_v17, %v747_v15  ;;  %v725_v21 = vadd.f32 %v724_v23, %v703_v13  ;;  %v766_v36 = vadd.f32 %v765_v35, %v764_v33 }
 0x223   : > { %v771_v25 = vsel %vm707_vm13, %v750_v19, 0.0 }
 0x224   : > { %v727_v34 = vadd.f32 %v726_v31, %v725_v21  ;;  %v770_v3 = vadd.f32 %v769_v29, %v749_v28 }
 0x225   : > { %722 = vadd.xlane.f32.xlu0 %v721_v32 }
 0x226   : > { %728 = vadd.xlane.f32.xlu1 %v727_v34  ;;  %v772_v30 = vadd.f32 %v771_v25, %v770_v3 }
 0x229   : > { %767 = vadd.xlane.f32.xlu0 %v766_v36 }
 0x22a   : > { %773 = vadd.xlane.f32.xlu1 %v772_v30 }
 0x2a3   : > { %v711_v37 = vpop.xlane.xlu1 %710 }
 0x2a4   : > { %731 = vst.msk [vmem:[%s253_s28] sm:$0xff] %vm730_vm14, %v711_v37 }
 0x2a6   : > { %v756_v38 = vpop.xlane.xlu0 %755 }
 0x2a7   : > { %775 = vst.msk [vmem:[%s262_s5] sm:$0xff] %vm730_vm14, %v756_v38 }
 0x2a9   : > { %v762_v39 = vpop.xlane.xlu1 %761 }
 0x2aa   : > { %v717_v40 = vpop.xlane.xlu0 %716  ;;  %776 = vst.msk [vmem:[%s262_s5 + $0x8] sm:$0xff] %vm730_vm14, %v762_v39 }
 0x2ab   : > { %732 = vst.msk [vmem:[%s253_s28 + $0x8] sm:$0xff] %vm730_vm14, %v717_v40 }
 0x2ae   : > { %v723_v41 = vpop.xlane.xlu0 %722 }
 0x2af   : > { %733 = vst.msk [vmem:[%s253_s28 + $0x10] sm:$0xff] %vm730_vm14, %v723_v41  ;;  %v729_v42 = vpop.xlane.xlu1 %728 }
 0x2b0   : > { %734 = vst.msk [vmem:[%s253_s28 + $0x18] sm:$0xff] %vm730_vm14, %v729_v42 }
 0x2b2   : > { %v768_v43 = vpop.xlane.xlu0 %767 }
 0x2b3   : > { %777 = vst.msk [vmem:[%s262_s5 + $0x10] sm:$0xff] %vm730_vm14, %v768_v43  ;;  %v774_v44 = vpop.xlane.xlu1 %773 }
 0x2b4   : > { %778 = vst.msk [vmem:[%s262_s5 + $0x18] sm:$0xff] %vm730_vm14, %v774_v44 }
 0x2b5 PF: > { %s15_s19 = sadd.s32 1, %s1050_s19   ;;  %s1373_s15 = smov %s1042_s17 }
 0x2b6   : > { %p12_p7 = scmp.ge.s32.totalorder %s15_s19, 6   ;;  %s1374_s16 = smov %s1046_s18 }
 0x2b7   : > { %s1375_s17 = smov %s1378_s20  ;;  %s1376_s18 = smov %s1382_s21 }
 0x2b8   :  { %14 = sbr.rel (!%p12_p7) target bundleno = 3 (0x3), region = 77 }

// kernel: fuser_layer_forward.3
= control target key start
LH: loop header
LB: loop body
LE: loop exit
PB: predicated region body
PF: predicated region fallthrough
CT: control target
= control target key end

     0   :  { %s1922_s24 = smov 0   ;;  %s1924_s25 = smov 0   ;;  %s2508_s0 = inlined_call_operand.vmem [shape: bf16[2,4,552], index: 0, kind: input, shape index: {}]   ;;  %s2509_s1 = inlined_call_operand.vmem [shape: bf16[2,32,36], index: 1, kind: input, shape index: {}]   ;;  %s2510_s2 = inlined_call_operand.vmem [shape: f32[1,456], index: 2, kind: input, shape index: {}]   ;;  %s2511_s3 = inlined_call_operand.vmem [shape: f32[2,32,1], index: 3, kind: input, shape index: {}]   ;;  %s2512_s4 = inlined_call_operand.vmem [shape: f32[2,32,1], index: 4, kind: input, shape index: {}]   ;;  %s2513_s5 = inlined_call_operand.vmem [shape: bf16[2,4,288], index: 5, kind: input, shape index: {}]   ;;  %s2514_s6 = inlined_call_operand.vmem [shape: f32[4,1], index: 6, kind: input, shape index: {}]   ;;  %s2515_s7 = inlined_call_operand.vmem [shape: f32[2,4,384], index: 7, kind: output, shape index: {}]  }
   0x1   :  { %s1926_s26 = smov 0   ;;  %s1928_s27 = smov 0  }
   0x2   :  { %s1930_s28 = smov 0  }
   0x3 LB: > { %s26_s29 = sadd.s32 1, %s1847_s26  ;;  %s29_s30 = sadd.s32 1, %s1851_s27  ;;  %s1855_s28 = sphi %s1930_s28, %s17_s28   ;;  %s1851_s27 = sphi %s1928_s27, %s2525_s27   ;;  %s1847_s26 = sphi %s1926_s26, %s2524_s26   ;;  %s1843_s25 = sphi %s1924_s25, %s2523_s25   ;;  %s1839_s24 = sphi %s1922_s24, %s2522_s24  }
   0x4   : > { %p27_p0 = scmp.ge.s32.totalorder %s26_s29, 2  ;;  %p1632_p1 = scmp.ge.s32.totalorder %s1855_s28, 1 }
   0x5   : > { %p289_p2 = scmp.lt.s32.totalorder %s1855_s28, 5 }
   0x6   : > { %s2527_s29 = smov (%p27_p0, %s26_s29), 0  ;;  %s2529_s30 = smov (!%p27_p0, %s29_s30), %s1851_s27 }
   0x7   : > { %2516 = sst [smem:[#allocation4_spill]] %s2527_s29  ;;  %p290_p3 = pnand %p1632_p1, %p289_p2 }
   0x8   : > { %p31_p4 = scmp.ge.s32.totalorder %s2529_s30, 2  ;;  %p341_p5 = scmp.lt.s32.totalorder (!%p290_p3), %s1843_s25, 1 }
   0x9   : > { %293 = sbr.rel (%p290_p3) target bundleno = 1178 (0x49a), region = 48  ;;  %p346_p6 = scmp.lt.s32.totalorder (!%p290_p3), %s1839_s24, 1 }
   0xa   : > { %s2531_s30 = smov (%p31_p4, %s2529_s30), 0  ;;  %p1642_p7 = scmp.ne.s32.totalorder (!%p290_p3), %s1839_s24, 0 }
   0xb   : > { %2517 = sst [smem:[#allocation5_spill]] %s2531_s30 }
   0xe   : > { %s2533_s25 = smov (!%p341_p5, %s1843_s25), 1  ;;  %s1863_s18 = smov (!%p1642_p7), 104  }
   0xf   : > { %s347_s8 = scalar_select %p346_p6, %s1839_s24, 1 }
  0x10   : > { %s1716_s9 = smul.u32 10, %s2533_s25  ;;  %s1864_s19 = smov (!%p1642_p7), 79  }
  0x11   : > { %s1680_s10 = sshll.u32 %s347_s8, 4  ;;  %s1681_s11 = sshll.u32 %s347_s8, 5 }
  0x12   : > { %s1959_s14 = scalar_lea.vmem %s2508_s0, %s1716_s9  ;;  %s1964_s17 = scalar_lea.vmem %s2509_s1, %s1680_s10 }
  0x13   : > { %s1969_s20 = scalar_lea.vmem %s2511_s3, %s1681_s11  ;;  %s1974_s23 = scalar_lea.vmem %s2512_s4, %s1681_s11 }
  0x14   : > { %s1717_s30 = smul.u32 6, %s347_s8  ;;  %s1861_s8 = smov (!%p1642_p7), 126  }
  0x15   : > { %s1718_s29 = smul.u32 12, %s2533_s25  ;;  %s1858_s25 = smov (!%p1642_p7), 127  }
  0x16   : > { %s1979_s13 = scalar_lea.vmem %s2513_s5, %s1717_s30  ;;  %375 = sbr.rel (%p1642_p7) target bundleno = 342 (0x156), region = 52 }
  0x17   : > { %s1984_s16 = scalar_lea.vmem %s2515_s7, %s1718_s29  ;;  %s1859_s29 = smov (!%p1642_p7), 103  }
  0x18   : > { %s1860_s30 = smov (!%p1642_p7), 102   ;;  %s1862_s11 = smov (!%p1642_p7), 80  }
  0x19   : > { %s1866_s21 = smov (!%p1642_p7), 105  }
  0x1b   : > { %v378_v0 = vld [vmem:[%s1959_s14] sm:$0xff]  ;;  %v385_v1 = vlaneseq  ;;  %v1857_v2 = vmov 1983009808   ;;  %v379_v17 = vld [vmem:[%s1959_s14 + $0x8] sm:$0x3]  ;;  %s1865_s14 = smov 78  }
  0x1c   : > { %v383_v3 = vunpack.c.l.s4 %v1857_v2  ;;  %v398_v6 = vcombine.low %v378_v0, %v378_v0  ;;  %v381_v10 = vcombine.high %v378_v0, %v378_v0  ;;  %v494_v21 = vcombine.low %v379_v17, %v379_v17 }
  0x1d   : > { %v386_v4 = vshrl.u32 %v385_v1, 7  ;;  %vm429_vm0 = vcmask 1031168   ;;  %vm415_vm1 = vcmask 1039360   ;;  %vm546_vm2 = vcmask 1043456  }
  0x1e   : > { %v384_v5 = vunpack.c.0.s8 %v383_v3  ;;  %vm442_vm3 = vcmask 850944   ;;  %vm533_vm4 = vcmask 1041408   ;;  %vm555_vm5 = vcmask 1045504  }
  0x1f   : > { %vm466_vm6 = vcmask 834560   ;;  %vm489_vm7 = vcmask 654336   ;;  %vm454_vm8 = vcmask 842752   ;;  %vm513_vm9 = vcmask 646144  }
  0x20   : > { %v387_v7 = vsub.s32 %v384_v5, %v386_v4  ;;  %vm528_vm10 = vcmask 637952   ;;  %vm688_vm11 = vcmask 588804   ;;  %vm662_vm12 = vcmask 859136  }
  0x21   : > { %vm2098_vm13 = vmor %vm688_vm11, %vm546_vm2  ;;  %vm698_vm14 = vcmask 586756  }
  0x22   : > { %v405_v8 = vrot.slane %v398_v6, %v387_v7  ;;  %v1988_v9 = vrot.slane %v378_v0, %v387_v7  ;;  %v1997_v13 = vrot.slane %v381_v10, %v387_v7  ;;  %v477_v18 = vrot.slane %v379_v17, %v387_v7  ;;  %vm699_vm15 = vmor %vm698_vm14, %vm533_vm4 }
  0x23   : > { %v501_v22 = vrot.slane %v494_v21, %v387_v7 }
  0x24   : > { %407 = vrot.lane.b32.xlu0 %v405_v8, %s1858_s25  ;;  %411 = vrot.lane.b32.xlu1 %v1988_v9, %s1858_s25  ;;  %v1993_v11 = vcombine.high %v1988_v9, %v1988_v9  ;;  %v406_v12 = vcombine.high %v405_v8, %v405_v8  ;;  %v2002_v14 = vcombine.high %v1997_v13, %v1997_v13 }
  0x25   : > { %v419_v15 = vcombine.low %v1988_v9, %v1988_v9  ;;  %v420_v16 = vcombine.low %v1997_v13, %v1997_v13  ;;  %v478_v19 = vcombine.low %v477_v18, %v477_v18  ;;  %v433_v20 = vcombine.low %v405_v8, %v405_v8 }
  0x26   : > { %v502_v23 = vcombine.low %v501_v22, %v501_v22 }
  0x28   : > { %446 = vrot.lane.b32.xlu0 %v1988_v9, %s1859_s29  ;;  %413 = vrot.lane.b32.xlu1 %v1993_v11, %s1858_s25 }
  0x2c   : > { %409 = vrot.lane.b32.xlu0 %v406_v12, %s1858_s25  ;;  %448 = vrot.lane.b32.xlu1 %v1993_v11, %s1859_s29 }
  0x30   : > { %450 = vrot.lane.b32.xlu0 %v1997_v13, %s1859_s29  ;;  %452 = vrot.lane.b32.xlu1 %v2002_v14, %s1859_s29 }
  0x34   : > { %458 = vrot.lane.b32.xlu0 %v405_v8, %s1860_s30  ;;  %460 = vrot.lane.b32.xlu1 %v406_v12, %s1860_s30 }
  0x38   : > { %462 = vrot.lane.b32.xlu0 %v1988_v9, %s1860_s30  ;;  %464 = vrot.lane.b32.xlu1 %v1993_v11, %s1860_s30 }
  0x3c   : > { %421 = vrot.lane.b32.xlu0 %v419_v15, %s1861_s8  ;;  %423 = vrot.lane.b32.xlu1 %v1988_v9, %s1861_s8 }
  0x40   : > { %425 = vrot.lane.b32.xlu0 %v420_v16, %s1861_s8  ;;  %427 = vrot.lane.b32.xlu1 %v1997_v13, %s1861_s8 }
  0x44   : > { %479 = vrot.lane.b32.xlu0 %v419_v15, %s1862_s11  ;;  %481 = vrot.lane.b32.xlu1 %v1988_v9, %s1862_s11 }
  0x48   : > { %483 = vrot.lane.b32.xlu0 %v420_v16, %s1862_s11  ;;  %485 = vrot.lane.b32.xlu1 %v1997_v13, %s1862_s11 }
  0x4c   : > { %487 = vrot.lane.b32.xlu0 %v478_v19, %s1862_s11  ;;  %434 = vrot.lane.b32.xlu1 %v433_v20, %s1863_s18 }
  0x50   : > { %436 = vrot.lane.b32.xlu0 %v405_v8, %s1863_s18  ;;  %438 = vrot.lane.b32.xlu1 %v419_v15, %s1863_s18 }
  0x54   : > { %440 = vrot.lane.b32.xlu0 %v1988_v9, %s1863_s18  ;;  %503 = vrot.lane.b32.xlu1 %v433_v20, %s1864_s19 }
  0x58   : > { %505 = vrot.lane.b32.xlu0 %v405_v8, %s1864_s19  ;;  %507 = vrot.lane.b32.xlu1 %v419_v15, %s1864_s19 }
  0x5c   : > { %509 = vrot.lane.b32.xlu0 %v1988_v9, %s1864_s19  ;;  %511 = vrot.lane.b32.xlu1 %v502_v23, %s1864_s19 }
  0x60   : > { %518 = vrot.lane.b32.xlu0 %v1988_v9, %s1865_s14  ;;  %520 = vrot.lane.b32.xlu1 %v1993_v11, %s1865_s14 }
  0x64   : > { %522 = vrot.lane.b32.xlu0 %v1997_v13, %s1865_s14  ;;  %524 = vrot.lane.b32.xlu1 %v2002_v14, %s1865_s14 }
  0x68   : > { %526 = vrot.lane.b32.xlu0 %v477_v18, %s1865_s14 }
  0x96   : > { %v408_v24 = vpop.permute.xlu0 %407  ;;  %v412_v25 = vpop.permute.xlu1 %411 }
  0x9a   : > { %v447_v26 = vpop.permute.xlu0 %446  ;;  %v414_v27 = vpop.permute.xlu1 %413 }
  0x9b   : > { %v418_v50 = vsel %vm415_vm1, %v412_v25, %v414_v27  ;;  %v545_v62 = vsel %vm533_vm4, %v2002_v14, %v414_v27 }
  0x9c   : > { %v542_v0 = vsel %vm533_vm4, %v1997_v13, %v418_v50 }
  0x9e   : > { %v410_v28 = vpop.permute.xlu0 %409  ;;  %v449_v29 = vpop.permute.xlu1 %448 }
  0x9f   : > { %v416_v46 = vsel %vm415_vm1, %v408_v24, %v410_v28  ;;  %v417_v47 = vsel %vm415_vm1, %v410_v28, %v412_v25  ;;  %v455_v10 = vsel %vm454_vm8, %v447_v26, %v449_v29 }
  0xa0   : > { %v536_v51 = vsel %vm533_vm4, %v1988_v9, %v416_v46  ;;  %v539_v52 = vsel %vm533_vm4, %v1993_v11, %v417_v47  ;;  %v1867_v47 = vmov 0.0  }
  0xa1   : > { %376 = vst [vmem:[#allocation2] sm:$0xff] %v1867_v47  ;;  %377 = vst [vmem:[#allocation2 + $0x8] sm:$0xf] %v1867_v47 }
  0xa2   : > { %v2023_v30 = vpop.permute.xlu0 %450  ;;  %v2025_v31 = vpop.permute.xlu1 %452 }
  0xa3   : > { %v456_v13 = vsel %vm454_vm8, %v449_v29, %v2023_v30  ;;  %v457_v26 = vsel %vm454_vm8, %v2023_v30, %v2025_v31 }
  0xa6   : > { %v459_v32 = vpop.permute.xlu0 %458  ;;  %v461_v33 = vpop.permute.xlu1 %460 }
  0xa7   : > { %v467_v1 = vsel %vm466_vm6, %v459_v32, %v461_v33 }
  0xa8   : > { %v566_v14 = vsel %vm533_vm4, %v455_v10, %v467_v1 }
  0xaa   : > { %v463_v34 = vpop.permute.xlu0 %462  ;;  %v2027_v35 = vpop.permute.xlu1 %464 }
  0xab   : > { %v468_v2 = vsel %vm466_vm6, %v461_v33, %v463_v34  ;;  %v469_v18 = vsel %vm466_vm6, %v463_v34, %v2027_v35 }
  0xac   : > { %v569_v17 = vsel %vm533_vm4, %v456_v13, %v468_v2  ;;  %v572_v32 = vsel %vm533_vm4, %v457_v26, %v469_v18 }
  0xae   : > { %v422_v36 = vpop.permute.xlu0 %421  ;;  %v424_v37 = vpop.permute.xlu1 %423 }
  0xaf   : > { %v430_v48 = vsel %vm429_vm0, %v422_v36, %v424_v37  ;;  %v575_v36 = vsel %vm533_vm4, %v2025_v31, %v2027_v35 }
  0xb0   : > { %v548_v55 = vsel %vm546_vm2, %v536_v51, %v430_v48 }
  0xb2   : > { %v426_v38 = vpop.permute.xlu0 %425  ;;  %v428_v39 = vpop.permute.xlu1 %427 }
  0xb3   : > { %v431_v49 = vsel %vm429_vm0, %v424_v37, %v426_v38  ;;  %v432_v59 = vsel %vm429_vm0, %v426_v38, %v428_v39  ;;  %v554_v3 = vsel %vm546_vm2, %v545_v62, %v428_v39 }
  0xb4   : > { %v550_v56 = vsel %vm546_vm2, %v539_v52, %v431_v49  ;;  %v552_v6 = vsel %vm546_vm2, %v542_v0, %v432_v59 }
  0xb6   : > { %v480_v40 = vpop.permute.xlu0 %479  ;;  %v482_v41 = vpop.permute.xlu1 %481 }
  0xb7   : > { %v490_v7 = vsel %vm489_vm7, %v480_v40, %v482_v41 }
  0xb8   : > { %v577_v19 = vsel %vm546_vm2, %v566_v14, %v490_v7 }
  0xba   : > { %v484_v42 = vpop.permute.xlu0 %483  ;;  %v2029_v43 = vpop.permute.xlu1 %485 }
  0xbb   : > { %v491_v11 = vsel %vm489_vm7, %v482_v41, %v484_v42  ;;  %v492_v20 = vsel %vm489_vm7, %v484_v42, %v2029_v43 }
  0xbc   : > { %v579_v23 = vsel %vm546_vm2, %v569_v17, %v491_v11  ;;  %v581_v37 = vsel %vm546_vm2, %v572_v32, %v492_v20 }
  0xbe   : > { %v488_v44 = vpop.permute.xlu0 %487  ;;  %v435_v45 = vpop.permute.xlu1 %434 }
  0xbf   : > { %v493_v27 = vsel %vm489_vm7, %v2029_v43, %v488_v44 }
  0xc0   : > { %v583_v30 = vsel %vm546_vm2, %v575_v36, %v493_v27 }
  0xc2   : > { %v437_v53 = vpop.permute.xlu0 %436  ;;  %v439_v54 = vpop.permute.xlu1 %438 }
  0xc3   : > { %v443_v57 = vsel %vm442_vm3, %v435_v45, %v437_v53  ;;  %v444_v58 = vsel %vm442_vm3, %v437_v53, %v439_v54 }
  0xc4   : > { %v557_v60 = vsel %vm555_vm5, %v548_v55, %v443_v57  ;;  %v559_v61 = vsel %vm555_vm5, %v550_v56, %v444_v58 }
  0xc5   : > { %v1643_v63 = vcombine.low %v557_v60, %v559_v61  ;;  %v1645_v16 = vcombine.high %v557_v60, %v559_v61 }
  0xc6   : > { %v441_v4 = vpop.permute.xlu0 %440  ;;  %v504_v5 = vpop.permute.xlu1 %503 }
  0xc7   : > { %v445_v8 = vsel %vm442_vm3, %v439_v54, %v441_v4  ;;  %v563_v9 = vsel %vm555_vm5, %v554_v3, %v441_v4  ;;  %630 = vrot.lane.b32.xlu1 %v1643_v63, %s1866_s21 }
  0xc8   : > { %v561_v12 = vsel %vm555_vm5, %v552_v6, %v445_v8 }
  0xc9   : > { %v1644_v15 = vcombine.low %v561_v12, %v563_v9  ;;  %v1646_v33 = vcombine.high %v561_v12, %v563_v9 }
  0xca   : > { %v506_v21 = vpop.permute.xlu0 %505  ;;  %v508_v22 = vpop.permute.xlu1 %507 }
  0xcb   : > { %v514_v24 = vsel %vm513_vm9, %v504_v5, %v506_v21  ;;  %v515_v25 = vsel %vm513_vm9, %v506_v21, %v508_v22  ;;  %634 = vrot.lane.b32.xlu1 %v1645_v16, %s1866_s21  ;;  %632 = vrot.lane.b32.xlu0 %v1644_v15, %s1866_s21 }
  0xcc   : > { %v585_v28 = vsel %vm555_vm5, %v577_v19, %v514_v24  ;;  %v587_v29 = vsel %vm555_vm5, %v579_v23, %v515_v25 }
  0xcd   : > { %v1647_v34 = vcombine.low %v585_v28, %v587_v29  ;;  %v1649_v44 = vcombine.high %v585_v28, %v587_v29 }
  0xce   : > { %v510_v38 = vpop.permute.xlu0 %509  ;;  %v512_v39 = vpop.permute.xlu1 %511 }
  0xcf   : > { %v516_v40 = vsel %vm513_vm9, %v508_v22, %v510_v38  ;;  %v517_v41 = vsel %vm513_vm9, %v510_v38, %v512_v39  ;;  %638 = vrot.lane.b32.xlu1 %v1647_v34, %s1866_s21  ;;  %636 = vrot.lane.b32.xlu0 %v1646_v33, %s1866_s21 }
  0xd0   : > { %v589_v42 = vsel %vm555_vm5, %v581_v37, %v516_v40  ;;  %v591_v43 = vsel %vm555_vm5, %v583_v30, %v517_v41 }
  0xd1   : > { %v1648_v31 = vcombine.low %v589_v42, %v591_v43  ;;  %v1650_v46 = vcombine.high %v589_v42, %v591_v43 }
  0xd2   : > { %v519_v35 = vpop.permute.xlu0 %518  ;;  %v521_v45 = vpop.permute.xlu1 %520 }
  0xd3   : > { %642 = vrot.lane.b32.xlu1 %v1649_v44, %s1866_s21  ;;  %640 = vrot.lane.b32.xlu0 %v1648_v31, %s1866_s21  ;;  %v529_v49 = vsel %vm528_vm10, %v519_v35, %v521_v45 }
  0xd6   : > { %v523_v48 = vpop.permute.xlu0 %522  ;;  %v525_v52 = vpop.permute.xlu1 %524 }
  0xd7   : > { %v530_v50 = vsel %vm528_vm10, %v521_v45, %v523_v48  ;;  %644 = vrot.lane.b32.xlu0 %v1650_v46, %s1866_s21  ;;  %v531_v54 = vsel %vm528_vm10, %v523_v48, %v525_v52 }
  0xd8   : > { %v1651_v51 = vcombine.low %v529_v49, %v530_v50 }
  0xda   : > { %v527_v53 = vpop.permute.xlu0 %526  ;;  %646 = vrot.lane.b32.xlu1 %v1651_v51, %s1866_s21 }
  0xdb   : > { %v532_v55 = vsel %vm528_vm10, %v525_v52, %v527_v53 }
  0xdc   : > { %v1652_v56 = vcombine.low %v531_v54, %v532_v55 }
  0xde   : > { %648 = vrot.lane.b32.xlu0 %v1652_v56, %s1866_s21 }
 0x139   : > { %v631_v57 = vpop.permute.xlu1 %630 }
 0x13a   : > { %v650_v60 = vrot.slane %v631_v57, 4 }
 0x13d   : > { %v635_v58 = vpop.permute.xlu1 %634  ;;  %v633_v59 = vpop.permute.xlu0 %632 }
 0x13e   : > { %v651_v62 = vrot.slane %v633_v59, 4  ;;  %v652_v4 = vrot.slane %v635_v58, 4 }
 0x140   : > { %v661_v63 = vsel %vm546_vm2, %v650_v60, %v651_v62  ;;  %v664_v0 = vsel %vm662_vm12, %v633_v59, %v651_v62 }
 0x141   : > { %v663_v1 = vsel %vm662_vm12, %v631_v57, %v661_v63  ;;  %690 = vst.msk [vmem:[#allocation3 + $0x8] sm:$0xff] %vm2098_vm13, %v664_v0  ;;  %v639_v2 = vpop.permute.xlu1 %638  ;;  %v637_v3 = vpop.permute.xlu0 %636 }
 0x142   : > { %687 = vst [vmem:[#allocation3] sm:$0xff] %v663_v1  ;;  %v653_v5 = vrot.slane %v637_v3, 4  ;;  %v654_v10 = vrot.slane %v639_v2, 4 }
 0x144   : > { %v665_v6 = vsel %vm546_vm2, %v652_v4, %v653_v5  ;;  %v667_v7 = vsel %vm662_vm12, %v637_v3, %v653_v5 }
 0x145   : > { %v666_v8 = vsel %vm662_vm12, %v635_v58, %v665_v6  ;;  %692 = vst.msk [vmem:[#allocation3 + $0x18] sm:$0xff] %vm2098_vm13, %v667_v7  ;;  %v641_v9 = vpop.permute.xlu0 %640  ;;  %v643_v12 = vpop.permute.xlu1 %642 }
 0x146   : > { %691 = vst [vmem:[#allocation3 + $0x10] sm:$0xff] %v666_v8  ;;  %v655_v11 = vrot.slane %v641_v9, 4  ;;  %v656_v17 = vrot.slane %v643_v12, 4 }
 0x148   : > { %v668_v13 = vsel %vm546_vm2, %v654_v10, %v655_v11  ;;  %v670_v14 = vsel %vm662_vm12, %v641_v9, %v655_v11 }
 0x149   : > { %v669_v15 = vsel %vm662_vm12, %v639_v2, %v668_v13  ;;  %694 = vst.msk [vmem:[#allocation3 + $0x28] sm:$0xff] %vm2098_vm13, %v670_v14  ;;  %v645_v16 = vpop.permute.xlu0 %644 }
 0x14a   : > { %693 = vst [vmem:[#allocation3 + $0x20] sm:$0xff] %v669_v15  ;;  %v657_v18 = vrot.slane %v645_v16, 4 }
 0x14c   : > { %v671_v19 = vsel %vm546_vm2, %v656_v17, %v657_v18  ;;  %v673_v20 = vsel %vm662_vm12, %v645_v16, %v657_v18  ;;  %v647_v22 = vpop.permute.xlu1 %646 }
 0x14d   : > { %v672_v21 = vsel %vm662_vm12, %v643_v12, %v671_v19  ;;  %696 = vst.msk [vmem:[#allocation3 + $0x38] sm:$0xff] %vm2098_vm13, %v673_v20  ;;  %v658_v24 = vrot.slane %v647_v22, 4 }
 0x14e   : > { %695 = vst [vmem:[#allocation3 + $0x30] sm:$0xff] %v672_v21 }
 0x150   : > { %v649_v23 = vpop.permute.xlu0 %648 }
 0x151   : > { %v659_v25 = vrot.slane %v649_v23, 4 }
 0x153   : > { %v674_v26 = vsel %vm546_vm2, %v658_v24, %v659_v25  ;;  %v676_v27 = vsel %vm662_vm12, %v649_v23, %v659_v25 }
 0x154   : > { %v675_v28 = vsel %vm662_vm12, %v647_v22, %v674_v26  ;;  %700 = vst.msk [vmem:[#allocation3 + $0x48] sm:$0x33] %vm699_vm15, %v676_v27 }
 0x155   : > { %697 = vst [vmem:[#allocation3 + $0x40] sm:$0x33] %v675_v28 }
 0x156 PF: > { %vm782_vm0 = vcmask 1041408   ;;  %v1793_v38 = vld [vmem:[#allocation3 + $0x24] ss:$16 sps:$4 sm:$0xff]   ;;  %v1795_v39 = vld [vmem:[#allocation3 + $0x2c] ss:$16 sps:$4 sm:$0xff]   ;;  %v1868_v31 = vmov 0   ;;  %v999_v60 = vlaneseq }
 0x157   : > { %v1797_v30 = vld [vmem:[#allocation3 + $0x20] ss:$16 sps:$4 sm:$0xff]   ;;  %v1798_v42 = vld [vmem:[#allocation3 + $0x28] ss:$16 sps:$4 sm:$0xff]   ;;  %v1799_v43 = vld [vmem:[#allocation3 + $0x4] ss:$16 sps:$4 sm:$0xff]   ;;  %827 = vmatprep.mubr.bf16.mxu0 %v1868_v31  ;;  %880 = vmatprep.mubr.bf16.mxu1 %v1868_v31 }
 0x158   : > { %v1801_v44 = vld [vmem:[#allocation3 + $0xc] ss:$16 sps:$4 sm:$0xff]   ;;  %v1803_v35 = vld [vmem:[#allocation3] ss:$16 sps:$4 sm:$0xff]   ;;  %1788 = vset.pattern.permute.xlu1 %v1868_v31  ;;  %1787 = vset.pattern.permute.xlu0 %v1868_v31  ;;  %v1804_v45 = vld [vmem:[#allocation3 + $0x8] ss:$16 sps:$4 sm:$0xff]  }
 0x159   : > { %v943_v46 = vld [vmem:[%s1974_s23 + $0x10] sm:$0xff]  ;;  %v1805_v48 = vld [vmem:[%s1964_s17] sm:$0xff]   ;;  %v944_v49 = vld [vmem:[%s1974_s23 + $0x18] sm:$0xff]  ;;  %vm775_vm1 = vcmask 293888   ;;  %v2148_v62 = vshrl.u32 %v999_v60, 7  ;;  %s1869_s22 = smov 104  }
 0x15a   : > { %v903_v47 = vld [vmem:[%s1969_s20 + $0x10] sm:$0xff]  ;;  %957 = vperm.xlu1 %1788, %v943_v46   ;;  %v904_v50 = vld [vmem:[%s1969_s20 + $0x18] sm:$0xff]  ;;  %v902_v51 = vld [vmem:[%s1969_s20 + $0x8] sm:$0xff]  ;;  %s1871_s12 = smov 127   ;;  %s1872_s9 = smov 78   ;;  %vm1241_vm2 = vcmask 646144  }
 0x15b   : > { %v714_v32 = vld [vmem:[#allocation3 + $0x48] sm:$0x33]  ;;  %917 = vperm.xlu0 %1787, %v903_v47   ;;  %v901_v52 = vld [vmem:[%s1969_s20] sm:$0xff]  ;;  %v1806_v53 = vld [vmem:[%s1964_s17 + $0x8] sm:$0xff]   ;;  %v1001_v7 = vsub.s32 0, %v2148_v62  ;;  %v1009_v8 = vsub.s32 2, %v2148_v62 }
 0x15c   : > { %v713_v29 = vld [vmem:[#allocation3 + $0x40] sm:$0x33]  ;;  %v1666_v34 = vcombine.high %v714_v32, %v714_v32  ;;  %v1665_v37 = vcombine.low %v714_v32, %v714_v32  ;;  %v941_v55 = vld [vmem:[%s1974_s23] sm:$0xff]  ;;  %v1013_v46 = vsub.s32 3, %v2148_v62  ;;  %s1873_s15 = smov 79   ;;  %s1874_s10 = smov 80  }
 0x15d   : > { %v1664_v33 = vcombine.high %v713_v29, %v713_v29  ;;  %v1663_v36 = vcombine.low %v713_v29, %v713_v29  ;;  %v942_v54 = vld [vmem:[%s1974_s23 + $0x8] sm:$0xff]  ;;  %v997_v10 = vld [vmem:[%s2510_s2] sm:$0xf]  ;;  %s1870_s23 = smov 126   ;;  %s1875_s25 = smov 102   ;;  %vm1212_vm3 = vcmask 654336  }
 0x15e   : > { %1670 = vmatprep.subr.msk.bf16.mxu1 %vm782_vm0, %v1666_v34  ;;  %v790_v41 = vsel %vm782_vm0, %v1665_v37, 0  ;;  %962 = vperm.xlu1 %1788, %v944_v49   ;;  %v2155_v17 = vrot.slane %v997_v10, %v1001_v7  ;;  %v2157_v18 = vrot.slane %v997_v10, %v1009_v8  ;;  %vm1125_vm4 = vcmask 850944   ;;  %p1675_p8 = scmp.ne.s32.totalorder %s1839_s24, 1 }
 0x15f   : > { %1667 = vmatprep.subr.msk.bf16.mxu0 %vm782_vm0, %v1664_v33  ;;  %v784_v40 = vsel %vm782_vm0, %v1663_v36, 0  ;;  %859 = vmatpush1.bf16.msra.mxu1 %v790_v41  ;;  %vm1096_vm5 = vcmask 1031168   ;;  %vm1067_vm6 = vcmask 1039360   ;;  %vm1270_vm7 = vcmask 637952  }
 0x160   : > { %806 = vmatpush1.bf16.msra.mxu0 %v784_v40  ;;  %860 = vmatprep.subr.bf16.mxu1 %v1795_v39  ;;  %vm1305_vm8 = vcmask 261120   ;;  %vm1183_vm9 = vcmask 834560   ;;  %vm1154_vm10 = vcmask 842752   ;;  %vm1879_vm11 = vmmov 0  }
 0x161   : > { %807 = vmatprep.subr.bf16.mxu0 %v1793_v38  ;;  %922 = vperm.xlu0 %1787, %v904_v50  }
 0x162   : > { %912 = vperm.xlu1 %1788, %v902_v51  }
 0x163   : > { %861 = vmatpush1.bf16.msra.mxu1 %v1798_v42 }
 0x164   : > { %808 = vmatpush1.bf16.msra.mxu0 %v1797_v30  ;;  %862 = vmatprep.subr.bf16.mxu1 %v1801_v44 }
 0x165   : > { %809 = vmatprep.subr.bf16.mxu0 %v1799_v43  ;;  %907 = vperm.xlu0 %1787, %v901_v52   ;;  %v1005_v43 = vsub.s32 1, %v2148_v62 }
 0x166   : > { %952 = vperm.xlu1 %1788, %v942_v54   ;;  %v2188_v54 = vrot.slane %v997_v10, %v1013_v46 }
 0x167   : > { %863 = vmatpush1.bf16.msra.mxu1 %v1804_v45 }
 0x168   : > { %810 = vmatpush1.bf16.msra.mxu0 %v1803_v35 }
 0x169   : > { %947 = vperm.xlu0 %1787, %v941_v55  }
 0x16a   : > { %1671 = vmatmul.mubr.msk.bf16.vlgmr.msra.gmra.mxu1 %vm775_vm1, %v1805_v48 }
 0x16b   : > { %1668 = vmatmul.mubr.msk.bf16.vlgmr.msra.gmra.mxu0 %vm775_vm1, %v1805_v48  ;;  %890 = vmatprep.mubr.bf16.mxu1 %v1868_v31  ;;  %v1006_v48 = vrot.slane %v997_v10, %v1005_v43 }
 0x16c   : > { %837 = vmatprep.mubr.bf16.mxu0 %v1868_v31 }
 0x172   : > { %1672 = vmatmul.mubr.msk.bf16.gmra.mxu1 %vm775_vm1, %v1806_v53 }
 0x173   : > { %1669 = vmatmul.mubr.msk.bf16.gmra.mxu0 %vm775_vm1, %v1806_v53  ;;  %1382 = vmatprep.mubr.bf16.mxu1 %v1868_v31 }
 0x1d5   : > { %v2142_v57 = vpop.permute.xlu1 %957 }
 0x1d6   : > { %v2140_v56 = vpop.permute.xlu0 %917 }
 0x1d9   : > { %v2146_v59 = vpop.permute.xlu1 %962 }
 0x1dc   : > { %v2144_v58 = vpop.permute.xlu0 %922 }
 0x1dd   : > { %v913_v1 = vpop.permute.xlu1 %912 }
 0x1e0   : > { %v908_v61 = vpop.permute.xlu0 %907 }
 0x1e1   : > { %v953_v16 = vpop.permute.xlu1 %952 }
 0x1e4   : > { %v948_v6 = vpop.permute.xlu0 %947 }
 0x22a   : > { %v882_v0 = vpop.f32.mrf.mxu1 }
 0x22b   : > { %v829_v63 = vpop.f32.mrf.mxu0  ;;  %v927_v3 = vmul.f32 %v908_v61, %v882_v0 }
 0x22c   : > { %v925_v2 = vmul.f32 %v908_v61, %v829_v63  ;;  %v884_v5 = vpop.f32.mrf.mxu1 }
 0x22d   : > { %v831_v4 = vpop.f32.mrf.mxu0  ;;  %v967_v11 = vadd.f32 %v948_v6, %v927_v3  ;;  %v928_v41 = vmul.f32 %v908_v61, %v884_v5 }
 0x22e   : > { %v965_v9 = vadd.f32 %v948_v6, %v925_v2  ;;  %v886_v13 = vpop.f32.mrf.mxu1  ;;  %v926_v38 = vmul.f32 %v908_v61, %v831_v4 }
 0x22f   : > { %v833_v12 = vpop.f32.mrf.mxu0  ;;  %v931_v15 = vmul.f32 %v913_v1, %v886_v13  ;;  %v983_v20 = vmax.f32 %v967_v11, 0.0  ;;  %v968_v45 = vadd.f32 %v948_v6, %v928_v41  ;;  %v1285_v41 = vld [vmem:[%s1979_s13] sm:$0x3f]  ;;  %s1877_s13 = smov 103  }
 0x230   : > { %v929_v14 = vmul.f32 %v913_v1, %v833_v12  ;;  %v981_v19 = vmax.f32 %v965_v9, 0.0  ;;  %v888_v36 = vpop.f32.mrf.mxu1  ;;  %v966_v42 = vadd.f32 %v948_v6, %v926_v38 }
 0x231   : > { %v971_v22 = vadd.f32 %v953_v16, %v931_v15  ;;  %v1021_v26 = vmul.f32 %v2157_v18, %v983_v20  ;;  %v835_v33 = vpop.f32.mrf.mxu0  ;;  %v932_v39 = vmul.f32 %v913_v1, %v888_v36  ;;  %v984_v53 = vmax.f32 %v968_v45, 0.0 }
 0x232   : > { %v969_v21 = vadd.f32 %v953_v16, %v929_v14  ;;  %v1019_v25 = vmul.f32 %v2155_v17, %v981_v19  ;;  %v930_v34 = vmul.f32 %v913_v1, %v835_v33  ;;  %v982_v47 = vmax.f32 %v966_v42, 0.0  ;;  %v892_v52 = vpop.f32.mrf.mxu1 }
 0x233   : > { %v987_v24 = vmax.f32 %v971_v22, 0.0  ;;  %v839_v37 = vpop.f32.mrf.mxu0  ;;  %v972_v44 = vadd.f32 %v953_v16, %v932_v39  ;;  %v1022_v2 = vmul.f32 %v2188_v54, %v984_v53  ;;  %v935_v11 = vmul.f32 %v2140_v56, %v892_v52 }
 0x234   : > { %v985_v23 = vmax.f32 %v969_v21, 0.0  ;;  %v970_v30 = vadd.f32 %v953_v16, %v930_v34  ;;  %v933_v55 = vmul.f32 %v2140_v56, %v839_v37  ;;  %v1020_v60 = vmul.f32 %v1006_v48, %v982_v47  ;;  %v894_v1 = vpop.f32.mrf.mxu1 }
 0x235   : > { %v1025_v28 = vmul.f32 %v2157_v18, %v987_v24  ;;  %v2175_v40 = vpop.f32.mrf.mxu0  ;;  %v988_v49 = vmax.f32 %v972_v44, 0.0  ;;  %v975_v14 = vadd.f32 %v2142_v57, %v935_v11  ;;  %v936_v37 = vmul.f32 %v2140_v56, %v894_v1 }
 0x236   : > { %v1023_v27 = vmul.f32 %v2155_v17, %v985_v23  ;;  %v986_v31 = vmax.f32 %v970_v30, 0.0  ;;  %v973_v3 = vadd.f32 %v2142_v57, %v933_v55  ;;  %v896_v6 = vpop.f32.mrf.mxu1  ;;  %v934_v23 = vmul.f32 %v2140_v56, %v2175_v40 }
 0x237   : > { %v2165_v32 = vpack.c.bf16 %v1025_v28, %v1021_v26  ;;  %v843_v35 = vpop.f32.mrf.mxu0  ;;  %v1026_v61 = vmul.f32 %v2188_v54, %v988_v49  ;;  %v939_v9 = vmul.f32 %v2144_v58, %v896_v6  ;;  %v991_v16 = vmax.f32 %v975_v14, 0.0 }
 0x238   : > { %v2163_v29 = vpack.c.bf16 %v1023_v27, %v1019_v25  ;;  %v937_v50 = vmul.f32 %v2144_v58, %v843_v35  ;;  %v1024_v51 = vmul.f32 %v1006_v48, %v986_v31  ;;  %v989_v7 = vmax.f32 %v973_v3, 0.0  ;;  %v898_v34 = vpop.f32.mrf.mxu1 }
 0x239   : > { %1113 = vrot.lane.b32.xlu0 %v2165_v32, %s1869_s22  ;;  %v2205_v4 = vpack.c.bf16 %v1026_v61, %v1022_v2  ;;  %v979_v13 = vadd.f32 %v2146_v59, %v939_v9  ;;  %v845_v19 = vpop.f32.mrf.mxu0  ;;  %v1029_v20 = vmul.f32 %v2157_v18, %v991_v16  ;;  %v974_v24 = vadd.f32 %v2142_v57, %v934_v23 }
 0x23a   : > { %1109 = vrot.lane.b32.xlu1 %v2163_v29, %s1869_s22  ;;  %v977_v63 = vadd.f32 %v2146_v59, %v937_v50  ;;  %v2197_v0 = vpack.c.bf16 %v1024_v51, %v1020_v60  ;;  %v1027_v10 = vmul.f32 %v2155_v17, %v989_v7  ;;  %v938_v22 = vmul.f32 %v2144_v58, %v845_v19 }
 0x23b   : > { %v995_v15 = vmax.f32 %v979_v13, 0.0  ;;  %v990_v26 = vmax.f32 %v974_v24, 0.0  ;;  %v940_v36 = vmul.f32 %v2144_v58, %v898_v34  ;;  %v1876_v39 = vmov 1983009808  }
 0x23c   : > { %v993_v5 = vmax.f32 %v977_v63, 0.0  ;;  %v1289_v30 = vunpack.c.l.s4 %v1876_v39  ;;  %v976_v40 = vadd.f32 %v2142_v57, %v936_v37  ;;  %v1287_v42 = vcombine.high %v1285_v41, %v1285_v41 }
 0x23d   : > { %1084 = vrot.lane.b32.xlu0 %v2165_v32, %s1870_s23  ;;  %v1028_v28 = vmul.f32 %v1006_v48, %v990_v26  ;;  %v980_v38 = vadd.f32 %v2146_v59, %v940_v36 }
 0x23e   : > { %1080 = vrot.lane.b32.xlu1 %v2163_v29, %s1870_s23  ;;  %v1031_v8 = vmul.f32 %v2155_v17, %v993_v5  ;;  %v1033_v17 = vmul.f32 %v2157_v18, %v995_v15  ;;  %v978_v18 = vadd.f32 %v2146_v59, %v938_v22  ;;  %v1290_v58 = vunpack.c.0.s8 %v1289_v30 }
 0x23f   : > { %v996_v56 = vmax.f32 %v980_v38, 0.0  ;;  %v992_v44 = vmax.f32 %v976_v40, 0.0 }
 0x240   : > { %v2219_v12 = vpack.c.bf16 %v1031_v8, %v1027_v10  ;;  %v2237_v21 = vpack.c.bf16 %v1033_v17, %v1029_v20  ;;  %v994_v25 = vmax.f32 %v978_v18, 0.0  ;;  %v1293_v43 = vsub.s32 %v1290_v58, %v2148_v62 }
 0x241   : > { %1055 = vrot.lane.b32.xlu0 %v2165_v32, %s1871_s12  ;;  %v1034_v59 = vmul.f32 %v2188_v54, %v996_v56  ;;  %v1030_v31 = vmul.f32 %v2188_v54, %v992_v44 }
 0x242   : > { %1254 = vrot.lane.b32.xlu1 %v2163_v29, %s1872_s9  ;;  %v1032_v27 = vmul.f32 %v1006_v48, %v994_v25  ;;  %v2284_v57 = vrot.slane %v1287_v42, %v1293_v43  ;;  %v2311_v45 = vrot.slane %v1285_v41, %v1293_v43 }
 0x243   : > { %v1042_v35 = vpack.c.bf16 %v1034_v59, %v1030_v31 }
 0x244   : > { %v2260_v33 = vpack.c.bf16 %v1032_v27, %v1028_v28  ;;  %v2317_v46 = vcombine.high %v2311_v45, %v2311_v45 }
 0x245   : > { %1051 = vrot.lane.b32.xlu0 %v2163_v29, %s1871_s12 }
 0x246   : > { %1229 = vrot.lane.b32.xlu1 %v2165_v32, %s1873_s15  ;;  %1341 = vmatprep.mubr.bf16.mxu0 %v2317_v46 }
 0x249   : > { %1258 = vrot.lane.b32.xlu0 %v2165_v32, %s1872_s9 }
 0x24a   : > { %1200 = vrot.lane.b32.xlu1 %v2165_v32, %s1874_s10 }
 0x24d   : > { %1225 = vrot.lane.b32.xlu0 %v2163_v29, %s1873_s15 }
 0x24e   : > { %1111 = vrot.lane.b32.xlu1 %v2197_v0, %s1869_s22 }
 0x251   : > { %1231 = vrot.lane.b32.xlu0 %v2205_v4, %s1873_s15 }
 0x252   : > { %1082 = vrot.lane.b32.xlu1 %v2197_v0, %s1870_s23 }
 0x255   : > { %1202 = vrot.lane.b32.xlu0 %v2205_v4, %s1874_s10 }
 0x256   : > { %1053 = vrot.lane.b32.xlu1 %v2197_v0, %s1871_s12 }
 0x259   : > { %1117 = vrot.lane.b32.xlu0 %v2219_v12, %s1869_s22 }
 0x25a   : > { %1256 = vrot.lane.b32.xlu1 %v2197_v0, %s1872_s9 }
 0x25d   : > { %1088 = vrot.lane.b32.xlu0 %v2219_v12, %s1870_s23 }
 0x25e   : > { %1115 = vrot.lane.b32.xlu1 %v2205_v4, %s1869_s22 }
 0x261   : > { %1059 = vrot.lane.b32.xlu0 %v2219_v12, %s1871_s12 }
 0x262   : > { %1227 = vrot.lane.b32.xlu1 %v2197_v0, %s1873_s15 }
 0x265   : > { %1266 = vrot.lane.b32.xlu0 %v2237_v21, %s1872_s9 }
 0x266   : > { %1086 = vrot.lane.b32.xlu1 %v2205_v4, %s1870_s23 }
 0x269   : > { %1237 = vrot.lane.b32.xlu0 %v2237_v21, %s1873_s15 }
 0x26a   : > { %1198 = vrot.lane.b32.xlu1 %v2197_v0, %s1874_s10 }
 0x26d   : > { %1208 = vrot.lane.b32.xlu0 %v2237_v21, %s1874_s10 }
 0x26e   : > { %1121 = vrot.lane.b32.xlu1 %v2237_v21, %s1869_s22 }
 0x271   : > { %1179 = vrot.lane.b32.xlu0 %v2237_v21, %s1875_s25 }
 0x272   : > { %1092 = vrot.lane.b32.xlu1 %v2237_v21, %s1870_s23 }
 0x275   : > { %1119 = vrot.lane.b32.xlu0 %v2260_v33, %s1869_s22 }
 0x276   : > { %1063 = vrot.lane.b32.xlu1 %v2237_v21, %s1871_s12 }
 0x279   : > { %1196 = vrot.lane.b32.xlu0 %v2163_v29, %s1874_s10 }
 0x27a   : > { %1262 = vrot.lane.b32.xlu1 %v2219_v12, %s1872_s9 }
 0x27d   : > { %1090 = vrot.lane.b32.xlu0 %v2260_v33, %s1870_s23 }
 0x27e   : > { %1233 = vrot.lane.b32.xlu1 %v2219_v12, %s1873_s15 }
 0x281   : > { %1061 = vrot.lane.b32.xlu0 %v2260_v33, %s1871_s12 }
 0x282   : > { %1204 = vrot.lane.b32.xlu1 %v2219_v12, %s1874_s10 }
 0x285   : > { %1173 = vrot.lane.b32.xlu0 %v2205_v4, %s1875_s25 }
 0x286   : > { %1264 = vrot.lane.b32.xlu1 %v2260_v33, %s1872_s9 }
 0x289   : > { %1123 = vrot.lane.b32.xlu0 %v1042_v35, %s1869_s22 }
 0x28a   : > { %1171 = vrot.lane.b32.xlu1 %v2165_v32, %s1875_s25 }
 0x28d   : > { %1235 = vrot.lane.b32.xlu0 %v2260_v33, %s1873_s15 }
 0x28e   : > { %1239 = vrot.lane.b32.xlu1 %v1042_v35, %s1873_s15 }
 0x291   : > { %1150 = vrot.lane.b32.xlu0 %v2237_v21, %s1877_s13 }
 0x292   : > { %1057 = vrot.lane.b32.xlu1 %v2205_v4, %s1871_s12 }
 0x295   : > { %1169 = vrot.lane.b32.xlu0 %v2197_v0, %s1875_s25 }
 0x296   : > { %1210 = vrot.lane.b32.xlu1 %v1042_v35, %s1874_s10 }
 0x299   : > { %1094 = vrot.lane.b32.xlu0 %v1042_v35, %s1870_s23 }
 0x29a   : > { %1175 = vrot.lane.b32.xlu1 %v2219_v12, %s1875_s25 }
 0x29d   : > { %1206 = vrot.lane.b32.xlu0 %v2260_v33, %s1874_s10 }
 0x29e   : > { %1181 = vrot.lane.b32.xlu1 %v1042_v35, %s1875_s25 }
 0x2a1   : > { %1065 = vrot.lane.b32.xlu0 %v1042_v35, %s1871_s12 }
 0x2a2   : > { %1167 = vrot.lane.b32.xlu1 %v2163_v29, %s1875_s25 }
 0x2a5   : > { %1177 = vrot.lane.b32.xlu0 %v2260_v33, %s1875_s25 }
 0x2a6   : > { %1152 = vrot.lane.b32.xlu1 %v1042_v35, %s1877_s13 }
 0x2a9   : > { %1142 = vrot.lane.b32.xlu0 %v2165_v32, %s1877_s13 }
 0x2aa   : > { %1144 = vrot.lane.b32.xlu1 %v2205_v4, %s1877_s13 }
 0x2ab   : > { %v2324_v47 = vpop.permute.xlu0 %1113 }
 0x2ac   : > { %v1110_v48 = vpop.permute.xlu1 %1109 }
 0x2ad   : > { %1148 = vrot.lane.b32.xlu0 %v2260_v33, %s1877_s13 }
 0x2ae   : > { %1146 = vrot.lane.b32.xlu1 %v2219_v12, %s1877_s13 }
 0x2af   : > { %v2328_v49 = vpop.permute.xlu0 %1084 }
 0x2b0   : > { %v1081_v50 = vpop.permute.xlu1 %1080 }
 0x2b1   : > { %1140 = vrot.lane.b32.xlu0 %v2197_v0, %s1877_s13 }
 0x2b2   : > { %1268 = vrot.lane.b32.xlu1 %v1042_v35, %s1872_s9 }
 0x2b3   : > { %v2332_v51 = vpop.permute.xlu0 %1055 }
 0x2b4   : > { %v2334_v52 = vpop.permute.xlu1 %1254 }
 0x2b5   : > { %1138 = vrot.lane.b32.xlu0 %v2163_v29, %s1877_s13 }
 0x2b6   : > { %1260 = vrot.lane.b32.xlu1 %v2205_v4, %s1872_s9 }
 0x2b7   : > { %v2339_v53 = vpop.permute.xlu0 %1051 }
 0x2b8   : > { %v2341_v54 = vpop.permute.xlu1 %1229 }
 0x2bb   : > { %v2343_v55 = vpop.permute.xlu0 %1258 }
 0x2bc   : > { %v2345_v60 = vpop.permute.xlu1 %1200 }
 0x2bf   : > { %v2347_v61 = vpop.permute.xlu0 %1225 }
 0x2c0   : > { %v1112_v63 = vpop.permute.xlu1 %1111 }
 0x2c1   : > { %v1127_v27 = vsel %vm1125_vm4, %v1112_v63, %v2324_v47  ;;  %v1126_v36 = vsel %vm1125_vm4, %v1110_v48, %v1112_v63 }
 0x2c3   : > { %v1232_v1 = vpop.permute.xlu0 %1231 }
 0x2c4   : > { %v1083_v2 = vpop.permute.xlu1 %1082  ;;  %v2351_v3 = vsel %vm1241_vm2, %v2341_v54, %v1232_v1 }
 0x2c5   : > { %v1098_v40 = vsel %vm1096_vm5, %v1083_v2, %v2328_v49  ;;  %v1097_v41 = vsel %vm1096_vm5, %v1081_v50, %v1083_v2 }
 0x2c7   : > { %v1203_v4 = vpop.permute.xlu0 %1202 }
 0x2c8   : > { %v1054_v5 = vpop.permute.xlu1 %1053  ;;  %v2355_v6 = vsel %vm1212_vm3, %v2345_v60, %v1203_v4 }
 0x2c9   : > { %v1069_v48 = vsel %vm1067_vm6, %v1054_v5, %v2332_v51  ;;  %v1068_v2 = vsel %vm1067_vm6, %v2339_v53, %v1054_v5 }
 0x2cb   : > { %v1118_v7 = vpop.permute.xlu0 %1117 }
 0x2cc   : > { %v1257_v8 = vpop.permute.xlu1 %1256 }
 0x2cd   : > { %v1272_v50 = vsel %vm1270_vm7, %v1257_v8, %v2343_v55  ;;  %v1271_v4 = vsel %vm1270_vm7, %v2334_v52, %v1257_v8 }
 0x2cf   : > { %v1089_v9 = vpop.permute.xlu0 %1088 }
 0x2d0   : > { %v2357_v10 = vpop.permute.xlu1 %1115 }
 0x2d1   : > { %v1128_v53 = vsel %vm1125_vm4, %v2324_v47, %v2357_v10 }
 0x2d3   : > { %v1060_v11 = vpop.permute.xlu0 %1059 }
 0x2d4   : > { %v2359_v13 = vpop.permute.xlu1 %1227 }
 0x2d5   : > { %v1242_v10 = vsel %vm1241_vm2, %v2347_v61, %v2359_v13 }
 0x2d7   : > { %v2361_v14 = vpop.permute.xlu0 %1266 }
 0x2d8   : > { %v2363_v15 = vpop.permute.xlu1 %1086 }
 0x2db   : > { %v2365_v16 = vpop.permute.xlu0 %1237 }
 0x2dc   : > { %v2367_v17 = vpop.permute.xlu1 %1198 }
 0x2df   : > { %v2369_v19 = vpop.permute.xlu0 %1208 }
 0x2e0   : > { %v1122_v20 = vpop.permute.xlu1 %1121 }
 0x2e3   : > { %v2371_v22 = vpop.permute.xlu0 %1179 }
 0x2e4   : > { %v2373_v23 = vpop.permute.xlu1 %1092 }
 0x2e7   : > { %v1120_v18 = vpop.permute.xlu0 %1119 }
 0x2e8   : > { %v2375_v24 = vpop.permute.xlu1 %1063  ;;  %v1129_v25 = vsel %vm1125_vm4, %v1118_v7, %v1120_v18  ;;  %v1130_v26 = vsel %vm1125_vm4, %v1120_v18, %v1122_v20 }
 0x2e9   : > { %1309 = vmatprep.subr.bf16.mxu0 %v1130_v26 }
 0x2ea   : > { %1310 = vmatpush1.bf16.msra.mxu0 %v1129_v25  ;;  %v1099_v25 = vsel %vm1096_vm5, %v2328_v49, %v2363_v15 }
 0x2eb   : > { %1311 = vmatprep.subr.bf16.mxu0 %v1127_v27  ;;  %v2381_v28 = vpop.permute.xlu0 %1196 }
 0x2ec   : > { %v1263_v34 = vpop.permute.xlu1 %1262 }
 0x2ee   : > { %1312 = vmatpush1.bf16.msra.mxu0 %v1126_v36 }
 0x2ef   : > { %v1091_v37 = vpop.permute.xlu0 %1090 }
 0x2f0   : > { %v1234_v38 = vpop.permute.xlu1 %1233  ;;  %v1100_v39 = vsel %vm1096_vm5, %v1089_v9, %v1091_v37  ;;  %v1101_v30 = vsel %vm1096_vm5, %v1091_v37, %v2373_v23 }
 0x2f1   : > { %1313 = vmatprep.subr.bf16.mxu0 %v1101_v30 }
 0x2f2   : > { %1314 = vmatpush1.bf16.msra.mxu0 %v1100_v39 }
 0x2f3   : > { %1315 = vmatprep.subr.bf16.mxu0 %v1098_v40  ;;  %v1062_v58 = vpop.permute.xlu0 %1061 }
 0x2f4   : > { %v2389_v56 = vpop.permute.xlu1 %1204  ;;  %v1072_v42 = vsel %vm1067_vm6, %v1062_v58, %v2375_v24  ;;  %v1071_v59 = vsel %vm1067_vm6, %v1060_v11, %v1062_v58 }
 0x2f6   : > { %1316 = vmatpush1.bf16.msra.mxu0 %v1097_v41  ;;  %v1878_v41 = vmov 0.0  }
 0x2f7   : > { %1317 = vmatprep.subr.bf16.mxu0 %v1072_v42  ;;  %v2394_v43 = vpop.permute.xlu0 %1173 }
 0x2f8   : > { %v1265_v44 = vpop.permute.xlu1 %1264 }
 0x2f9   : > { %v1274_v31 = vsel %vm1270_vm7, %v1263_v34, %v1265_v44  ;;  %v1275_v35 = vsel %vm1270_vm7, %v1265_v44, %v2361_v14 }
 0x2fa   : > { %1362 = vmatprep.subr.bf16.mxu1 %v1275_v35  ;;  %1318 = vmatpush1.bf16.msra.mxu0 %v1071_v59 }
 0x2fb   : > { %1363 = vmatpush1.bf16.msra.mxu1 %v1274_v31  ;;  %1319 = vmatprep.subr.bf16.mxu0 %v1069_v48  ;;  %v1124_v63 = vpop.permute.xlu0 %1123 }
 0x2fc   : > { %1364 = vmatprep.subr.bf16.mxu1 %v1272_v50  ;;  %v2404_v1 = vpop.permute.xlu1 %1171  ;;  %v1131_v18 = vsel %vm1125_vm4, %v1122_v20, %v1124_v63 }
 0x2fd   : > { %v1186_v27 = vsel %vm1183_vm9, %v2404_v1, %v2394_v43 }
 0x2fe   : > { %1320 = vmatpush1.bf16.msra.mxu0 %v1068_v2 }
 0x2ff   : > { %1365 = vmatpush1.bf16.msra.mxu1 %v1271_v4  ;;  %1321 = vmatprep.subr.bf16.mxu0 %v2260_v33  ;;  %v1236_v7 = vpop.permute.xlu0 %1235 }
 0x300   : > { %v1240_v9 = vpop.permute.xlu1 %1239  ;;  %v1245_v8 = vsel %vm1241_vm2, %v1234_v38, %v1236_v7 }
 0x301   : > { %v1247_v11 = vsel %vm1241_vm2, %v2365_v16, %v1240_v9 }
 0x302   : > { %1683 = vmatprep.subr.bf16.mxu1 %v1247_v11  ;;  %1322 = vmatpush1.bf16.msra.mxu0 %v2219_v12  ;;  %v1246_v12 = vsel %vm1241_vm2, %v1236_v7, %v2365_v16 }
 0x303   : > { %1673 = vmatmul.mubr.msk.bf16.vlgmr.msra.gmra.mxu1 %vm1305_vm8, %v2284_v57  ;;  %1323 = vmatprep.subr.bf16.mxu0 %v2197_v0  ;;  %v2418_v52 = vpop.permute.xlu0 %1150 }
 0x304   : > { %1684 = vmatpush3.bf16.msra.mxu1 %v1131_v18  ;;  %v1058_v33 = vpop.permute.xlu1 %1057  ;;  %1423 = vmatprep.mubr.bf16.mxu1 %v2317_v46  ;;  %v1284_v18 = vld [vmem:[#allocation2 + $0x8] sm:$0xf] }
 0x305   : > { %1685 = vmatprep.subr.bf16.mxu1 %v2351_v3 }
 0x306   : > { %1324 = vmatpush1.bf16.msra.mxu0 %v2163_v29  ;;  %v1243_v29 = vsel %vm1241_vm2, %v2359_v13, %v2341_v54 }
 0x307   : > { %1325 = vmatprep.subr.bf16.mxu0 %v1246_v12  ;;  %v1170_v5 = vpop.permute.xlu0 %1169 }
 0x308   : > { %1686 = vmatpush3.bf16.msra.mxu1 %v1128_v53  ;;  %v1211_v0 = vpop.permute.xlu1 %1210 }
 0x309   : > { %v1218_v46 = vsel %vm1212_vm3, %v2369_v19, %v1211_v0  ;;  %v1283_v0 = vld [vmem:[#allocation2] sm:$0xff] }
 0x30a   : > { %1687 = vmatprep.subr.bf16.mxu1 %v1218_v46  ;;  %1326 = vmatpush2.bf16.msra.mxu0 %v1245_v8 }
 0x30b   : > { %1327 = vmatprep.subr.bf16.mxu0 %v1243_v29  ;;  %v1095_v3 = vpop.permute.xlu0 %1094 }
 0x30c   : > { %v1176_v16 = vpop.permute.xlu1 %1175  ;;  %v1102_v47 = vsel %vm1096_vm5, %v2373_v23, %v1095_v3 }
 0x30d   : > { %1688 = vmatpush3.bf16.msra.mxu1 %v1102_v47 }
 0x30e   : > { %1328 = vmatpush2.bf16.msra.mxu0 %v1242_v10  ;;  %1689 = vmatprep.subr.bf16.mxu1 %v2355_v6  ;;  %v1214_v6 = vsel %vm1212_vm3, %v2367_v17, %v2345_v60  ;;  %v1070_v60 = vsel %vm1067_vm6, %v2332_v51, %v1058_v33 }
 0x30f   : > { %v1207_v20 = vpop.permute.xlu0 %1206 }
 0x310   : > { %v1182_v54 = vpop.permute.xlu1 %1181  ;;  %v1216_v26 = vsel %vm1212_vm3, %v2389_v56, %v1207_v20  ;;  %v1217_v23 = vsel %vm1212_vm3, %v1207_v20, %v2369_v19  ;;  %v1213_v19 = vsel %vm1212_vm3, %v2381_v28, %v2367_v17  ;;  %v1185_v28 = vsel %vm1183_vm9, %v1170_v5, %v2404_v1 }
 0x311   : > { %1329 = vmatprep.subr.bf16.mxu0 %v1217_v23  ;;  %1690 = vmatpush3.bf16.msra.mxu1 %v1099_v25  ;;  %v1189_v61 = vsel %vm1183_vm9, %v2371_v22, %v1182_v54 }
 0x312   : > { %1330 = vmatpush2.bf16.msra.mxu0 %v1216_v26  ;;  %1691 = vmatprep.subr.bf16.mxu1 %v1189_v61 }
 0x313   : > { %1331 = vmatprep.subr.bf16.mxu0 %v1214_v6  ;;  %v1066_v49 = vpop.permute.xlu0 %1065 }
 0x314   : > { %v1168_v13 = vpop.permute.xlu1 %1167  ;;  %v1073_v15 = vsel %vm1067_vm6, %v2375_v24, %v1066_v49 }
 0x315   : > { %1692 = vmatpush3.bf16.msra.mxu1 %v1073_v15  ;;  %v1184_v51 = vsel %vm1183_vm9, %v1168_v13, %v1170_v5 }
 0x316   : > { %1332 = vmatpush2.bf16.msra.mxu0 %v1213_v19  ;;  %1693 = vmatprep.subr.bf16.mxu1 %v1186_v27 }
 0x317   : > { %v1178_v34 = vpop.permute.xlu0 %1177 }
 0x318   : > { %v1153_v36 = vpop.permute.xlu1 %1152  ;;  %v1187_v37 = vsel %vm1183_vm9, %v1176_v16, %v1178_v34  ;;  %v1188_v24 = vsel %vm1183_vm9, %v1178_v34, %v2371_v22 }
 0x319   : > { %1333 = vmatprep.subr.bf16.mxu0 %v1188_v24  ;;  %1694 = vmatpush3.bf16.msra.mxu1 %v1070_v60  ;;  %v1160_v17 = vsel %vm1154_vm10, %v2418_v52, %v1153_v36 }
 0x31a   : > { %1334 = vmatpush2.bf16.msra.mxu0 %v1187_v37  ;;  %1695 = vmatprep.subr.bf16.mxu1 %v1160_v17 }
 0x31b   : > { %1335 = vmatprep.subr.bf16.mxu0 %v1185_v28  ;;  %v1143_v38 = vpop.permute.xlu0 %1142 }
 0x31c   : > { %v1145_v39 = vpop.permute.xlu1 %1144 }
 0x31d   : > { %1696 = vmatpush3.bf16.msra.mxu1 %v2237_v21  ;;  %v1157_v30 = vsel %vm1154_vm10, %v1143_v38, %v1145_v39 }
 0x31e   : > { %1336 = vmatpush2.bf16.msra.mxu0 %v1184_v51  ;;  %1697 = vmatprep.subr.bf16.mxu1 %v1157_v30 }
 0x31f   : > { %v1149_v22 = vpop.permute.xlu0 %1148 }
 0x320   : > { %v1147_v40 = vpop.permute.xlu1 %1146  ;;  %v1159_v58 = vsel %vm1154_vm10, %v1149_v22, %v2418_v52 }
 0x321   : > { %v1158_v56 = vsel %vm1154_vm10, %v1147_v40, %v1149_v22  ;;  %1337 = vmatprep.subr.bf16.mxu0 %v1159_v58  ;;  %1698 = vmatpush3.bf16.msra.mxu1 %v2165_v32 }
 0x322   : > { %1338 = vmatpush2.bf16.msra.mxu0 %v1158_v56  ;;  %1708 = vmatprep.subr.bf16.mxu1 %v1878_v41 }
 0x323   : > { %v1141_v42 = vpop.permute.xlu0 %1140 }
 0x324   : > { %v1269_v43 = vpop.permute.xlu1 %1268  ;;  %1424 = vmatmul.mubr.bf16.vlgmr.msra.gmra.mxu1 %v2311_v45  ;;  %v1156_v21 = vsel %vm1154_vm10, %v1141_v42, %v1143_v38 }
 0x325   : > { %v1276_v44 = vsel %vm1270_vm7, %v2361_v14, %v1269_v43  ;;  %1339 = vmatprep.subr.bf16.mxu0 %v1156_v21  ;;  %1712 = vmatprep.mubr.msk.bf16.mxu1 %vm1879_vm11, %v1878_v41 }
 0x326   : > { %1709 = vmatpush3.bf16.msra.mxu1 %v1276_v44 }
 0x327   : > { %v1139_v59 = vpop.permute.xlu0 %1138  ;;  %1710 = vmatprep.subr.bf16.mxu1 %v1878_v41 }
 0x328   : > { %v1261_v31 = vpop.permute.xlu1 %1260  ;;  %v1155_v32 = vsel %vm1154_vm10, %v1139_v59, %v1141_v42 }
 0x329   : > { %v1273_v35 = vsel %vm1270_vm7, %v2343_v55, %v1261_v31  ;;  %1340 = vmatpush2.bf16.msra.mxu0 %v1155_v32 }
 0x32a   : > { %1711 = vmatpush3.bf16.msra.mxu1 %v1273_v35 }
 0x32c   : > { %1342 = vmatmul.mubr.bf16.vlgmr.msra.gmra.mxu0 %v2311_v45 }
 0x32d   : > { %1713 = vmatmul.mubr.msk.bf16.vlgmr.msra.gmra.mxu1 %vm1305_vm8, %v2284_v57 }
 0x3c3   : > { %v1384_v14 = vpop.f32.mrf.mxu1 }
 0x3c5   : > { %v1386_v48 = vpop.f32.mrf.mxu1 }
 0x3c7   : > { %v1388_v50 = vpop.f32.mrf.mxu1 }
 0x3c9   : > { %v1389_v63 = vpop.f32.mrf.mxu1 }
 0x3e4   : > { %v1699_v1 = vpop.f32.mrf.mxu1 }
 0x3e6   : > { %v1700_v2 = vpop.f32.mrf.mxu1 }
 0x3e7   : > { %v1701_v9 = vadd.f32 %v1700_v2, %v1699_v1 }
 0x3e8   : > { %v1702_v4 = vpop.f32.mrf.mxu1 }
 0x3ea   : > { %v1703_v7 = vpop.f32.mrf.mxu1 }
 0x3ec   : > { %v1343_v11 = vpop.f32.mrf.mxu0 }
 0x3ed   : > { %v1465_v52 = vpop.f32.mrf.mxu1  ;;  %v1385_v12 = vadd.f32 %v1384_v14, %v1343_v11 }
 0x3ee   : > { %v1466_v55 = vadd.f32 %v1701_v9, %v1465_v52  ;;  %v1345_v33 = vpop.f32.mrf.mxu0 }
 0x3ef   : > { %v1387_v53 = vadd.f32 %v1386_v48, %v1345_v33  ;;  %v1714_v45 = vpop.f32.mrf.mxu1 }
 0x3f0   : > { %v1476_v5 = vadd.f32 %v1466_v55, %v1284_v18  ;;  %v1347_v57 = vpop.f32.mrf.mxu0 }
 0x3f1   : > { %v1473_v8 = vcombine.low %v1385_v12, %v1387_v53  ;;  %v1468_v46 = vpop.f32.mrf.mxu1  ;;  %1482 = sbr.rel (%p1675_p8) target bundleno = 1178 (0x49a), region = 56 }
 0x3f2   : > { %1478 = vst [vmem:[#allocation2 + $0x8] sm:$0xf] %v1476_v5  ;;  %v1348_v29 = vpop.f32.mrf.mxu0 }
 0x3f3   : > { %v1475_v3 = vadd.f32 %v1473_v8, %v1283_v0  ;;  %v1715_v16 = vpop.f32.mrf.mxu1 }
 0x3f5   : > { %1477 = vst [vmem:[#allocation2] sm:$0xff] %v1475_v3 }
 0x3f6   : > { %v1485_v47 = vld [vmem:[%s2514_s6] sm:$0xf]  ;;  %v1880_v10 = vmov 0   ;;  %v1881_v20 = vmov 839922192  }
 0x3f7   : > { %1808 = vset.pattern.permute.xlu0 %v1880_v10  ;;  %v1491_v25 = vunpack.c.l.s4 %v1881_v20 }
 0x3f8   : > { %1488 = vperm.xlu0 %1808, %v1485_v47  }
 0x3f9   : > { %v1492_v54 = vunpack.c.0.s8 %v1491_v25  ;;  %v1484_v6 = vld [vmem:[#allocation2 + $0x8] sm:$0xf] }
 0x3fb   : > { %v1495_v26 = vsub.s32 %v1492_v54, %v2148_v62 }
 0x3fc   : > { %v1483_v61 = vld [vmem:[#allocation2] sm:$0xff] }
 0x473   : > { %v1489_v23 = vpop.permute.xlu0 %1488 }
 0x474   : > { %v1496_v49 = vrot.slane %v1489_v23, %v1495_v26 }
 0x476   : > { %v1498_v13 = vadd.f32 %v1496_v49, %v1483_v61  ;;  %v1499_v15 = vadd.f32 %v1496_v49, %v1484_v6 }
 0x478   : > { %v1676_v19 = vmul.f32 -1.442695, %v1498_v13  ;;  %v1677_v27 = vmul.f32 -1.442695, %v1499_v15 }
 0x47a   : > { %1809 = vpow2.f32 %v1676_v19 }
 0x47b   : > { %1811 = vpow2.f32 %v1677_v27 }
 0x487   : > { %v1810_v34 = vpop.eup %1809 }
 0x488   : > { %v1812_v60 = vpop.eup %1811  ;;  %v1506_v36 = vadd.f32 1.0, %v1810_v34 }
 0x489   : > { %v1507_v37 = vadd.f32 1.0, %v1812_v60 }
 0x48a   : > { %1813 = vrcp.f32 %v1506_v36 }
 0x48b   : > { %1815 = vrcp.f32 %v1507_v37 }
 0x497   : > { %v1814_v24 = vpop.eup %1813 }
 0x498   : > { %v1816_v62 = vpop.eup %1815  ;;  %1512 = vst [vmem:[%s1984_s16] sm:$0xff] %v1814_v24 }
 0x499   : > { %1513 = vst [vmem:[%s1984_s16 + $0x8] sm:$0xf] %v1816_v62 }
 0x49a PF: > { %s17_s28 = sadd.s32 1, %s1855_s28   ;;  %s2520_s8 = sld [smem:[#allocation4_spill]] }
 0x49b   : > { %p14_p9 = scmp.ge.s32.totalorder %s17_s28, 6   ;;  %s2521_s11 = sld [smem:[#allocation5_spill]] }
 0x49c   : > { %s2522_s24 = smov %s1847_s26  ;;  %s2523_s25 = smov %s1851_s27 }
 0x49d   :  { %16 = sbr.rel (!%p14_p9) target bundleno = 3 (0x3), region = 98 }
 0x4a0   : > { %s2524_s26 = smov %s2520_s8 }
 0x4a1   : > { %s2525_s27 = smov %s2521_s11 }

</bundles_post_ra>
